<compile_context>
chip_gen: v7x
topology: tpu7x:2x2x1
jax: 0.10.0
libtpu: 0.0.40
codegen_flags: <defaults>
</compile_context>

<pallas_src>
import functools

import jax
import jax.numpy as jnp
import numpy as np
from jax import lax
from jax.experimental import pallas as pl
from jax.experimental.pallas import tpu as pltpu

_BN_EPS = 1e-5


# ------------------------------ Pallas kernel -------------------------------

def _conv2x_kernel(xph_ref, rem_ref, w1_ref, w2t_ref, b1_ref, b2_ref,
                   o_ref, xcp_ref, *, ho, wo):
    """Fused conv1(s=2) + BN1 + ReLU + concat + conv2(s=1) + BN2 + ReLU.

    xph_ref : (1, 4, ph, pw, Cin)    bf16  phase-split (space-to-depth) padded x
    rem_ref : (1, ho, wo, Cout)      bf16
    w1_ref  : (9*Cin, Cout)          bf16  BN1-scale-folded conv1 weights
    w2t_ref : (Cout, 9*2*Cout)       bf16  BN2-scale-folded conv2 weights (transposed)
    b1_ref  : (1, Cout)              f32   BN1 folded bias
    b2_ref  : (Cout, 1)              f32   BN2 folded bias
    o_ref   : (1, Cout, ho*wo)       bf16  NCHW output (spatial flattened)
    xcp_ref : (ho+2, wo+2, 2*Cout)   bf16  VMEM halo scratch: concat([x1, rem])
    """
    kk = 3
    cin = xph_ref.shape[-1]
    cout = rem_ref.shape[-1]
    zc = 2 * cout

    # ---- conv1 (3x3, stride 2): ONE GEMM, K = 9*Cin ------------------------
    # The 9 taps are unit-stride static slices of the phase-split input; they
    # are concatenated along K so the MXU sees a single (ho*wo, 9*Cin) LHS.
    taps1 = []
    for kh in range(kk):
        for kw in range(kk):
            phase = (kh % 2) * 2 + (kw % 2)
            a, b = kh // 2, kw // 2
            taps1.append(
                xph_ref[0, phase, a:a + ho, b:b + wo, :].reshape(ho * wo, cin))
    lhs1 = jnp.concatenate(taps1, axis=1)                   # (ho*wo, 9*cin)
    acc1 = jnp.dot(lhs1, w1_ref[...], preferred_element_type=jnp.float32)
    x1 = jnp.maximum(acc1 + b1_ref[...], 0.0)               # (ho*wo, cout) f32

    # ---- physical concat([x1, rem]) into ONE halo scratch ------------------
    # Only the 1-wide border ring is ever read as zero; the interior is fully
    # overwritten every step, so zero just the border.  Never gate this on
    # program_id==0: with a megacore-parallel grid each core owns its scratch.
    xcp_ref[0:1, :, :] = jnp.zeros((1, wo + 2, zc), xcp_ref.dtype)
    xcp_ref[ho + 1:ho + 2, :, :] = jnp.zeros((1, wo + 2, zc), xcp_ref.dtype)
    xcp_ref[1:ho + 1, 0:1, :] = jnp.zeros((ho, 1, zc), xcp_ref.dtype)
    xcp_ref[1:ho + 1, wo + 1:wo + 2, :] = jnp.zeros((ho, 1, zc), xcp_ref.dtype)
    xc = jnp.concatenate(
        [x1.reshape(ho, wo, cout).astype(xcp_ref.dtype), rem_ref[0]], axis=-1)
    xcp_ref[1:ho + 1, 1:wo + 1, :] = xc      # (sublane-offset-1 store; minor cost)

    # ---- conv2 (3x3, stride 1): ONE GEMM, K = 9*2*Cout ----------------------
    # Single im2col build (9 structured window reads concatenated along K);
    # the GEMM is computed as W2^T @ LHS^T (transposed-RHS contraction) so the
    # result is already channel-major -> NCHW store with no extra transpose.
    taps2 = [xcp_ref[kh:kh + ho, kw:kw + wo, :].reshape(ho * wo, zc)
             for kh in range(kk) for kw in range(kk)]
    lhs2 = jnp.concatenate(taps2, axis=1)                   # (ho*wo, 9*2*cout)
    acc2t = lax.dot_general(                                # (cout, ho*wo)
        w2t_ref[...], lhs2,
        dimension_numbers=(((1,), (1,)), ((), ())),
        preferred_element_type=jnp.float32)
    y = jnp.maximum(acc2t + b2_ref[...], 0.0)
    o_ref[0] = y.astype(o_ref.dtype)


# ------------------------------ forward wrapper ------------------------------

@jax.jit
def conv2x_forward(x_nchw, rem_nchw, params):
    x = jnp.transpose(x_nchw, (0, 2, 3, 1))                       # NCHW -> NHWC
    rem = jnp.transpose(rem_nchw, (0, 2, 3, 1)).astype(jnp.bfloat16)
    n, h, w, cin = x.shape
    cout = rem.shape[-1]
    ho = (h + 2 - 3) // 2 + 1
    wo = (w + 2 - 3) // 2 + 1
    assert rem.shape == (n, ho, wo, cout)

    # Stride-2 phase split (space-to-depth) of the zero-padded input.  Same
    # total bytes as x (no 9x im2col blow-up in HBM); every 3x3/stride-2 tap
    # becomes a unit-stride static slice inside the kernel.
    ph, pw = (h + 3) // 2, (w + 3) // 2        # ceil((H+2)/2), ceil((W+2)/2)
    x_pad = jnp.pad(x, ((0, 0), (1, 2 * ph - h - 1), (1, 2 * pw - w - 1), (0, 0)))
    xph = (x_pad.reshape(n, ph, 2, pw, 2, cin)
           .transpose(0, 2, 4, 1, 3, 5)         # (n, row-par, col-par, ph, pw, c)
           .reshape(n, 4, ph, pw, cin)
           .astype(jnp.bfloat16))

    out = pl.pallas_call(
        functools.partial(_conv2x_kernel, ho=ho, wo=wo),
        out_shape=jax.ShapeDtypeStruct((n, cout, ho * wo), jnp.bfloat16),
        grid_spec=pltpu.PrefetchScalarGridSpec(
            num_scalar_prefetch=0,
            grid=(n,),
            in_specs=[
                pl.BlockSpec((1, 4, ph, pw, cin), lambda i: (i, 0, 0, 0, 0)),
                pl.BlockSpec((1, ho, wo, cout), lambda i: (i, 0, 0, 0)),
                # grid-invariant weights / biases (tiny at Cout=8)
                pl.BlockSpec((9 * cin, cout), lambda i: (0, 0)),
                pl.BlockSpec((cout, 9 * 2 * cout), lambda i: (0, 0)),
                pl.BlockSpec((1, cout), lambda i: (0, 0)),
                pl.BlockSpec((cout, 1), lambda i: (0, 0)),
            ],
            out_specs=pl.BlockSpec((1, cout, ho * wo), lambda i: (i, 0, 0)),
            scratch_shapes=[
                pltpu.VMEM((ho + 2, wo + 2, 2 * cout), jnp.bfloat16),
            ],
        ),
        compiler_params=pltpu.CompilerParams(
            dimension_semantics=("parallel",),
            vmem_limit_bytes=32 * 1024 * 1024,
        ),
    )(xph, rem, params["w1k"], params["w2k"], params["b1k"], params["b2k"])

    # (n, cout, ho*wo) -> (n, cout, ho, wo): pure reshape, no extra HBM pass.
    return out.reshape(n, cout, ho, wo)


# ------------------------------ parameters ----------------------------------

def make_conv2x_params(key, in_channels, out_channels):
    ks = jax.random.split(key, 10)
    w1 = 0.1 * jax.random.normal(ks[0], (3, 3, in_channels, out_channels), jnp.float32)
    w2 = 0.1 * jax.random.normal(ks[1], (3, 3, 2 * out_channels, out_channels), jnp.float32)
    g1 = jax.random.uniform(ks[2], (out_channels,), jnp.float32, 0.5, 1.5)
    be1 = 0.1 * jax.random.normal(ks[3], (out_channels,), jnp.float32)
    rm1 = 0.1 * jax.random.normal(ks[4], (out_channels,), jnp.float32)
    rv1 = jax.random.uniform(ks[5], (out_channels,), jnp.float32, 0.5, 1.5)
    g2 = jax.random.uniform(ks[6], (out_channels,), jnp.float32, 0.5, 1.5)
    be2 = 0.1 * jax.random.normal(ks[7], (out_channels,), jnp.float32)
    rm2 = 0.1 * jax.random.normal(ks[8], (out_channels,), jnp.float32)
    rv2 = jax.random.uniform(ks[9], (out_channels,), jnp.float32, 0.5, 1.5)

    s1 = g1 / jnp.sqrt(rv1 + _BN_EPS); b1 = be1 - rm1 * s1
    s2 = g2 / jnp.sqrt(rv2 + _BN_EPS); b2 = be2 - rm2 * s2

    # Fold BN scale into the conv weights; cast to bf16 for the MXU.
    w1f_hwio = (w1 * s1).astype(jnp.bfloat16)                 # (3,3,Cin,  Cout)
    w2f_hwio = (w2 * s2).astype(jnp.bfloat16)                 # (3,3,2Cout,Cout)

    return {
        # kernel-side parameters
        "w1k": w1f_hwio.reshape(9 * in_channels, out_channels),          # (9Cin, Cout)
        "w2k": jnp.transpose(
            w2f_hwio.reshape(9 * 2 * out_channels, out_channels)),       # (Cout, 18Cout)
        "b1k": b1.reshape(1, out_channels).astype(jnp.float32),
        "b2k": b2.reshape(out_channels, 1).astype(jnp.float32),
        # reference-side parameters (same bf16 quantization points)
        "w1_hwio": w1f_hwio,
        "w2_hwio": w2f_hwio,
        "b1_ref": b1.reshape(1, 1, 1, out_channels),
        "b2_ref": b2.reshape(1, 1, 1, out_channels),
    }


# ------------------------------ reference (JAX) ------------------------------

@jax.jit
def conv2x_reference(x_nchw, rem_nchw, params):
    x = jnp.transpose(x_nchw, (0, 2, 3, 1)).astype(jnp.bfloat16)
    rem = jnp.transpose(rem_nchw, (0, 2, 3, 1)).astype(jnp.bfloat16)
    y1 = jax.lax.conv_general_dilated(
        x, params["w1_hwio"], (2, 2), [(1, 1), (1, 1)],
        dimension_numbers=("NHWC", "HWIO", "NHWC"),
        preferred_element_type=jnp.float32)
    x1 = jnp.maximum(y1 + params["b1_ref"], 0.0)
    xc = jnp.concatenate([x1.astype(jnp.bfloat16), rem], axis=-1)
    y2 = jax.lax.conv_general_dilated(
        xc, params["w2_hwio"], (1, 1), [(1, 1), (1, 1)],
        dimension_numbers=("NHWC", "HWIO", "NHWC"),
        preferred_element_type=jnp.float32)
    out = jnp.maximum(y2 + params["b2_ref"], 0.0)
    return jnp.transpose(out, (0, 3, 1, 2))


# ---------------------------------- main -------------------------------------

if __name__ == "__main__":
    key = jax.random.PRNGKey(0)
    k_x, k_rem, k_p = jax.random.split(key, 3)

    N, Cin, Cout, H, W = 2, 4, 8, 16, 16
    Ho, Wo = (H + 2 - 3) // 2 + 1, (W + 2 - 3) // 2 + 1    # stride-2 conv output

    x = jax.random.normal(k_x, (N, Cin, H, W), jnp.float32)         # NCHW (PyTorch)
    rem = jax.random.normal(k_rem, (N, Cout, Ho, Wo), jnp.float32)  # NCHW (PyTorch)
    params = make_conv2x_params(k_p, Cin, Cout)

    out = jax.block_until_ready(conv2x_forward(x, rem, params))
    ref = jax.block_until_ready(conv2x_reference(x, rem, params))

    assert out.shape == (N, Cout, Ho, Wo), out.shape
    np.testing.assert_allclose(np.asarray(out.astype(jnp.float32)),
                               np.asarray(ref, np.float32),
                               rtol=2e-2, atol=2e-2)

    print("KERNEL_OK")
</pallas_src>

<mosaic_0001>
module attributes {stable_mosaic.version = 11 : i64} {
  func.func @_conv2x_kernel(%arg0: i32, %arg1: memref<1x4x9x9x4xbf16, #tpu.memory_space<vmem>>, %arg2: memref<1x8x8x8xbf16, #tpu.memory_space<vmem>>, %arg3: memref<36x8xbf16, #tpu.memory_space<vmem>>, %arg4: memref<8x144xbf16, #tpu.memory_space<vmem>>, %arg5: memref<1x8xf32, #tpu.memory_space<vmem>>, %arg6: memref<8x1xf32, #tpu.memory_space<vmem>>, %arg7: memref<1x8x64xbf16, #tpu.memory_space<vmem>>, %arg8: memref<10x10x16xbf16, #tpu.memory_space<vmem>>) attributes {dimension_semantics = [#tpu.dimension_semantics<parallel>], iteration_bounds = array<i64: 2>, scalar_prefetch = 0 : i64, scratch_operands = 1 : i64, tpu.core_type = #tpu.core_type<tc>, window_params = [{transform_indices = @transform_0, window_bounds = array<i64: 1, 4, 9, 9, 4>}, {transform_indices = @transform_1, window_bounds = array<i64: 1, 8, 8, 8>}, {pipeline_mode = #tpu.pipeline_mode<synchronous>, transform_indices = @transform_2, window_bounds = array<i64: 36, 8>}, {pipeline_mode = #tpu.pipeline_mode<synchronous>, transform_indices = @transform_3, window_bounds = array<i64: 8, 144>}, {pipeline_mode = #tpu.pipeline_mode<synchronous>, transform_indices = @transform_4, window_bounds = array<i64: 1, 8>}, {pipeline_mode = #tpu.pipeline_mode<synchronous>, transform_indices = @transform_5, window_bounds = array<i64: 8, 1>}, {transform_indices = @transform_6, window_bounds = array<i64: 1, 8, 64>}]} {
    %c0 = arith.constant 0 : index
    %c0_0 = arith.constant 0 : index
    %c0_1 = arith.constant 0 : index
    %c0_2 = arith.constant 0 : index
    %c0_3 = arith.constant 0 : index
    %0 = vector.load %arg1[%c0, %c0_0, %c0_1, %c0_2, %c0_3] : memref<1x4x9x9x4xbf16, #tpu.memory_space<vmem>>, vector<1x1x8x8x4xbf16>
    %1 = vector.shape_cast %0 : vector<1x1x8x8x4xbf16> to vector<8x8x4xbf16>
    %2 = vector.shape_cast %1 : vector<8x8x4xbf16> to vector<64x4xbf16>
    %c0_4 = arith.constant 0 : index
    %c1 = arith.constant 1 : index
    %c0_5 = arith.constant 0 : index
    %c0_6 = arith.constant 0 : index
    %c0_7 = arith.constant 0 : index
    %3 = vector.load %arg1[%c0_4, %c1, %c0_5, %c0_6, %c0_7] : memref<1x4x9x9x4xbf16, #tpu.memory_space<vmem>>, vector<1x1x8x8x4xbf16>
    %4 = vector.shape_cast %3 : vector<1x1x8x8x4xbf16> to vector<8x8x4xbf16>
    %5 = vector.shape_cast %4 : vector<8x8x4xbf16> to vector<64x4xbf16>
    %c0_8 = arith.constant 0 : index
    %c0_9 = arith.constant 0 : index
    %c0_10 = arith.constant 0 : index
    %c1_11 = arith.constant 1 : index
    %c0_12 = arith.constant 0 : index
    %6 = vector.load %arg1[%c0_8, %c0_9, %c0_10, %c1_11, %c0_12] : memref<1x4x9x9x4xbf16, #tpu.memory_space<vmem>>, vector<1x1x8x8x4xbf16>
    %7 = vector.shape_cast %6 : vector<1x1x8x8x4xbf16> to vector<8x8x4xbf16>
    %8 = vector.shape_cast %7 : vector<8x8x4xbf16> to vector<64x4xbf16>
    %c0_13 = arith.constant 0 : index
    %c2 = arith.constant 2 : index
    %c0_14 = arith.constant 0 : index
    %c0_15 = arith.constant 0 : index
    %c0_16 = arith.constant 0 : index
    %9 = vector.load %arg1[%c0_13, %c2, %c0_14, %c0_15, %c0_16] : memref<1x4x9x9x4xbf16, #tpu.memory_space<vmem>>, vector<1x1x8x8x4xbf16>
    %10 = vector.shape_cast %9 : vector<1x1x8x8x4xbf16> to vector<8x8x4xbf16>
    %11 = vector.shape_cast %10 : vector<8x8x4xbf16> to vector<64x4xbf16>
    %c0_17 = arith.constant 0 : index
    %c3 = arith.constant 3 : index
    %c0_18 = arith.constant 0 : index
    %c0_19 = arith.constant 0 : index
    %c0_20 = arith.constant 0 : index
    %12 = vector.load %arg1[%c0_17, %c3, %c0_18, %c0_19, %c0_20] : memref<1x4x9x9x4xbf16, #tpu.memory_space<vmem>>, vector<1x1x8x8x4xbf16>
    %13 = vector.shape_cast %12 : vector<1x1x8x8x4xbf16> to vector<8x8x4xbf16>
    %14 = vector.shape_cast %13 : vector<8x8x4xbf16> to vector<64x4xbf16>
    %c0_21 = arith.constant 0 : index
    %c2_22 = arith.constant 2 : index
    %c0_23 = arith.constant 0 : index
    %c1_24 = arith.constant 1 : index
    %c0_25 = arith.constant 0 : index
    %15 = vector.load %arg1[%c0_21, %c2_22, %c0_23, %c1_24, %c0_25] : memref<1x4x9x9x4xbf16, #tpu.memory_space<vmem>>, vector<1x1x8x8x4xbf16>
    %16 = vector.shape_cast %15 : vector<1x1x8x8x4xbf16> to vector<8x8x4xbf16>
    %17 = vector.shape_cast %16 : vector<8x8x4xbf16> to vector<64x4xbf16>
    %c0_26 = arith.constant 0 : index
    %c0_27 = arith.constant 0 : index
    %c1_28 = arith.constant 1 : index
    %c0_29 = arith.constant 0 : index
    %c0_30 = arith.constant 0 : index
    %18 = vector.load %arg1[%c0_26, %c0_27, %c1_28, %c0_29, %c0_30] : memref<1x4x9x9x4xbf16, #tpu.memory_space<vmem>>, vector<1x1x8x8x4xbf16>
    %19 = vector.shape_cast %18 : vector<1x1x8x8x4xbf16> to vector<8x8x4xbf16>
    %20 = vector.shape_cast %19 : vector<8x8x4xbf16> to vector<64x4xbf16>
    %c0_31 = arith.constant 0 : index
    %c1_32 = arith.constant 1 : index
    %c1_33 = arith.constant 1 : index
    %c0_34 = arith.constant 0 : index
    %c0_35 = arith.constant 0 : index
    %21 = vector.load %arg1[%c0_31, %c1_32, %c1_33, %c0_34, %c0_35] : memref<1x4x9x9x4xbf16, #tpu.memory_space<vmem>>, vector<1x1x8x8x4xbf16>
    %22 = vector.shape_cast %21 : vector<1x1x8x8x4xbf16> to vector<8x8x4xbf16>
    %23 = vector.shape_cast %22 : vector<8x8x4xbf16> to vector<64x4xbf16>
    %c0_36 = arith.constant 0 : index
    %c0_37 = arith.constant 0 : index
    %c1_38 = arith.constant 1 : index
    %c1_39 = arith.constant 1 : index
    %c0_40 = arith.constant 0 : index
    %24 = vector.load %arg1[%c0_36, %c0_37, %c1_38, %c1_39, %c0_40] : memref<1x4x9x9x4xbf16, #tpu.memory_space<vmem>>, vector<1x1x8x8x4xbf16>
    %25 = vector.shape_cast %24 : vector<1x1x8x8x4xbf16> to vector<8x8x4xbf16>
    %26 = vector.shape_cast %25 : vector<8x8x4xbf16> to vector<64x4xbf16>
    %27 = tpu.concatenate %2, %5, %8, %11, %14, %17, %20, %23, %26 in 1 : vector<64x4xbf16>, vector<64x4xbf16>, vector<64x4xbf16>, vector<64x4xbf16>, vector<64x4xbf16>, vector<64x4xbf16>, vector<64x4xbf16>, vector<64x4xbf16>, vector<64x4xbf16> -> vector<64x36xbf16>
    %c0_41 = arith.constant 0 : index
    %c0_42 = arith.constant 0 : index
    %28 = vector.load %arg3[%c0_41, %c0_42] : memref<36x8xbf16, #tpu.memory_space<vmem>>, vector<36x8xbf16>
    %cst = arith.constant dense<0.000000e+00> : vector<64x8xf32>
    %29 = tpu.matmul %27, %28, %cst {dimension_numbers = #tpu.dot_dimension_numbers<[1], [0], [0], [1], [0, 0, 1, 1], [], []>} : vector<64x36xbf16>, vector<36x8xbf16>, vector<64x8xf32> -> vector<64x8xf32>
    %c0_43 = arith.constant 0 : index
    %c0_44 = arith.constant 0 : index
    %30 = vector.load %arg5[%c0_43, %c0_44] : memref<1x8xf32, #tpu.memory_space<vmem>>, vector<1x8xf32>
    %31 = vector.broadcast %30 : vector<1x8xf32> to vector<64x8xf32>
    %32 = arith.addf %29, %31 : vector<64x8xf32>
    %cst_45 = arith.constant 0.000000e+00 : f32
    %33 = vector.broadcast %cst_45 : f32 to vector<64x8xf32>
    %34 = arith.maximumf %32, %33 : vector<64x8xf32>
    %cst_46 = arith.constant 0.000000e+00 : bf16
    %35 = vector.broadcast %cst_46 : bf16 to vector<1x10x16xbf16>
    %c0_47 = arith.constant 0 : index
    %c0_48 = arith.constant 0 : index
    %c0_49 = arith.constant 0 : index
    %36 = vector.load %arg8[%c0_47, %c0_48, %c0_49] : memref<10x10x16xbf16, #tpu.memory_space<vmem>>, vector<1x10x16xbf16>
    tpu.vector_store %arg8[%c0_47, %c0_48, %c0_49], %35 {strides = array<i32>} : memref<10x10x16xbf16, #tpu.memory_space<vmem>>, vector<1x10x16xbf16>,
    %cst_50 = arith.constant 0.000000e+00 : bf16
    %37 = vector.broadcast %cst_50 : bf16 to vector<1x10x16xbf16>
    %c9 = arith.constant 9 : index
    %c0_51 = arith.constant 0 : index
    %c0_52 = arith.constant 0 : index
    %38 = vector.load %arg8[%c9, %c0_51, %c0_52] : memref<10x10x16xbf16, #tpu.memory_space<vmem>>, vector<1x10x16xbf16>
    tpu.vector_store %arg8[%c9, %c0_51, %c0_52], %37 {strides = array<i32>} : memref<10x10x16xbf16, #tpu.memory_space<vmem>>, vector<1x10x16xbf16>,
    %cst_53 = arith.constant 0.000000e+00 : bf16
    %39 = vector.broadcast %cst_53 : bf16 to vector<8x1x16xbf16>
    %c1_54 = arith.constant 1 : index
    %c0_55 = arith.constant 0 : index
    %c0_56 = arith.constant 0 : index
    %40 = vector.load %arg8[%c1_54, %c0_55, %c0_56] : memref<10x10x16xbf16, #tpu.memory_space<vmem>>, vector<8x1x16xbf16>
    tpu.vector_store %arg8[%c1_54, %c0_55, %c0_56], %39 {strides = array<i32>} : memref<10x10x16xbf16, #tpu.memory_space<vmem>>, vector<8x1x16xbf16>,
    %cst_57 = arith.constant 0.000000e+00 : bf16
    %41 = vector.broadcast %cst_57 : bf16 to vector<8x1x16xbf16>
    %c1_58 = arith.constant 1 : index
    %c9_59 = arith.constant 9 : index
    %c0_60 = arith.constant 0 : index
    %42 = vector.load %arg8[%c1_58, %c9_59, %c0_60] : memref<10x10x16xbf16, #tpu.memory_space<vmem>>, vector<8x1x16xbf16>
    tpu.vector_store %arg8[%c1_58, %c9_59, %c0_60], %41 {strides = array<i32>} : memref<10x10x16xbf16, #tpu.memory_space<vmem>>, vector<8x1x16xbf16>,
    %43 = vector.shape_cast %34 : vector<64x8xf32> to vector<8x8x8xf32>
    %44 = arith.truncf %43 : vector<8x8x8xf32> to vector<8x8x8xbf16>
    %c0_61 = arith.constant 0 : index
    %c0_62 = arith.constant 0 : index
    %c0_63 = arith.constant 0 : index
    %c0_64 = arith.constant 0 : index
    %45 = vector.load %arg2[%c0_61, %c0_62, %c0_63, %c0_64] : memref<1x8x8x8xbf16, #tpu.memory_space<vmem>>, vector<1x8x8x8xbf16>
    %46 = vector.shape_cast %45 : vector<1x8x8x8xbf16> to vector<8x8x8xbf16>
    %47 = tpu.concatenate %44, %46 in 2 : vector<8x8x8xbf16>, vector<8x8x8xbf16> -> vector<8x8x16xbf16>
    %c1_65 = arith.constant 1 : index
    %c1_66 = arith.constant 1 : index
    %c0_67 = arith.constant 0 : index
    %48 = vector.load %arg8[%c1_65, %c1_66, %c0_67] : memref<10x10x16xbf16, #tpu.memory_space<vmem>>, vector<8x8x16xbf16>
    tpu.vector_store %arg8[%c1_65, %c1_66, %c0_67], %47 {strides = array<i32>} : memref<10x10x16xbf16, #tpu.memory_space<vmem>>, vector<8x8x16xbf16>,
    %c0_68 = arith.constant 0 : index
    %c0_69 = arith.constant 0 : index
    %c0_70 = arith.constant 0 : index
    %49 = vector.load %arg8[%c0_68, %c0_69, %c0_70] : memref<10x10x16xbf16, #tpu.memory_space<vmem>>, vector<8x8x16xbf16>
    %50 = vector.shape_cast %49 : vector<8x8x16xbf16> to vector<64x16xbf16>
    %c0_71 = arith.constant 0 : index
    %c1_72 = arith.constant 1 : index
    %c0_73 = arith.constant 0 : index
    %51 = vector.load %arg8[%c0_71, %c1_72, %c0_73] : memref<10x10x16xbf16, #tpu.memory_space<vmem>>, vector<8x8x16xbf16>
    %52 = vector.shape_cast %51 : vector<8x8x16xbf16> to vector<64x16xbf16>
    %c0_74 = arith.constant 0 : index
    %c2_75 = arith.constant 2 : index
    %c0_76 = arith.constant 0 : index
    %53 = vector.load %arg8[%c0_74, %c2_75, %c0_76] : memref<10x10x16xbf16, #tpu.memory_space<vmem>>, vector<8x8x16xbf16>
    %54 = vector.shape_cast %53 : vector<8x8x16xbf16> to vector<64x16xbf16>
    %c1_77 = arith.constant 1 : index
    %c0_78 = arith.constant 0 : index
    %c0_79 = arith.constant 0 : index
    %55 = vector.load %arg8[%c1_77, %c0_78, %c0_79] : memref<10x10x16xbf16, #tpu.memory_space<vmem>>, vector<8x8x16xbf16>
    %56 = vector.shape_cast %55 : vector<8x8x16xbf16> to vector<64x16xbf16>
    %c1_80 = arith.constant 1 : index
    %c1_81 = arith.constant 1 : index
    %c0_82 = arith.constant 0 : index
    %57 = vector.load %arg8[%c1_80, %c1_81, %c0_82] : memref<10x10x16xbf16, #tpu.memory_space<vmem>>, vector<8x8x16xbf16>
    %58 = vector.shape_cast %57 : vector<8x8x16xbf16> to vector<64x16xbf16>
    %c1_83 = arith.constant 1 : index
    %c2_84 = arith.constant 2 : index
    %c0_85 = arith.constant 0 : index
    %59 = vector.load %arg8[%c1_83, %c2_84, %c0_85] : memref<10x10x16xbf16, #tpu.memory_space<vmem>>, vector<8x8x16xbf16>
    %60 = vector.shape_cast %59 : vector<8x8x16xbf16> to vector<64x16xbf16>
    %c2_86 = arith.constant 2 : index
    %c0_87 = arith.constant 0 : index
    %c0_88 = arith.constant 0 : index
    %61 = vector.load %arg8[%c2_86, %c0_87, %c0_88] : memref<10x10x16xbf16, #tpu.memory_space<vmem>>, vector<8x8x16xbf16>
    %62 = vector.shape_cast %61 : vector<8x8x16xbf16> to vector<64x16xbf16>
    %c2_89 = arith.constant 2 : index
    %c1_90 = arith.constant 1 : index
    %c0_91 = arith.constant 0 : index
    %63 = vector.load %arg8[%c2_89, %c1_90, %c0_91] : memref<10x10x16xbf16, #tpu.memory_space<vmem>>, vector<8x8x16xbf16>
    %64 = vector.shape_cast %63 : vector<8x8x16xbf16> to vector<64x16xbf16>
    %c2_92 = arith.constant 2 : index
    %c2_93 = arith.constant 2 : index
    %c0_94 = arith.constant 0 : index
    %65 = vector.load %arg8[%c2_92, %c2_93, %c0_94] : memref<10x10x16xbf16, #tpu.memory_space<vmem>>, vector<8x8x16xbf16>
    %66 = vector.shape_cast %65 : vector<8x8x16xbf16> to vector<64x16xbf16>
    %67 = tpu.concatenate %50, %52, %54, %56, %58, %60, %62, %64, %66 in 1 : vector<64x16xbf16>, vector<64x16xbf16>, vector<64x16xbf16>, vector<64x16xbf16>, vector<64x16xbf16>, vector<64x16xbf16>, vector<64x16xbf16>, vector<64x16xbf16>, vector<64x16xbf16> -> vector<64x144xbf16>
    %c0_95 = arith.constant 0 : index
    %c0_96 = arith.constant 0 : index
    %68 = vector.load %arg4[%c0_95, %c0_96] : memref<8x144xbf16, #tpu.memory_space<vmem>>, vector<8x144xbf16>
    %cst_97 = arith.constant dense<0.000000e+00> : vector<8x64xf32>
    %69 = tpu.matmul %68, %67, %cst_97 {dimension_numbers = #tpu.dot_dimension_numbers<[1], [1], [0], [0], [0, 0, 1, 0], [], []>} : vector<8x144xbf16>, vector<64x144xbf16>, vector<8x64xf32> -> vector<8x64xf32>
    %c0_98 = arith.constant 0 : index
    %c0_99 = arith.constant 0 : index
    %70 = vector.load %arg6[%c0_98, %c0_99] : memref<8x1xf32, #tpu.memory_space<vmem>>, vector<8x1xf32>
    %71 = vector.broadcast %70 : vector<8x1xf32> to vector<8x64xf32>
    %72 = arith.addf %69, %71 : vector<8x64xf32>
    %cst_100 = arith.constant 0.000000e+00 : f32
    %73 = vector.broadcast %cst_100 : f32 to vector<8x64xf32>
    %74 = arith.maximumf %72, %73 : vector<8x64xf32>
    %75 = arith.truncf %74 : vector<8x64xf32> to vector<8x64xbf16>
    %c0_101 = arith.constant 0 : index
    %c0_102 = arith.constant 0 : index
    %c0_103 = arith.constant 0 : index
    %76 = vector.load %arg7[%c0_101, %c0_102, %c0_103] : memref<1x8x64xbf16, #tpu.memory_space<vmem>>, vector<1x8x64xbf16>
    %77 = vector.shape_cast %76 : vector<1x8x64xbf16> to vector<8x64xbf16>
    %78 = vector.shape_cast %75 : vector<8x64xbf16> to vector<1x8x64xbf16>
    tpu.vector_store %arg7[%c0_101, %c0_102, %c0_103], %78 {strides = array<i32>} : memref<1x8x64xbf16, #tpu.memory_space<vmem>>, vector<1x8x64xbf16>,
    return
  }
  func.func @transform_0(%arg0: i32) -> (i32, i32, i32, i32, i32) {
    %c0_i32 = arith.constant 0 : i32
    %c0_i32_0 = arith.constant 0 : i32
    %c0_i32_1 = arith.constant 0 : i32
    %c0_i32_2 = arith.constant 0 : i32
    %c0_i32_3 = arith.constant 0 : i32
    return %arg0, %c0_i32, %c0_i32_0, %c0_i32_1, %c0_i32_2 : i32, i32, i32, i32, i32
  }
  func.func @transform_1(%arg0: i32) -> (i32, i32, i32, i32) {
    %c0_i32 = arith.constant 0 : i32
    %c0_i32_0 = arith.constant 0 : i32
    %c0_i32_1 = arith.constant 0 : i32
    %c0_i32_2 = arith.constant 0 : i32
    return %arg0, %c0_i32, %c0_i32_0, %c0_i32_1 : i32, i32, i32, i32
  }
  func.func @transform_2(%arg0: i32) -> (i32, i32) {
    %c0_i32 = arith.constant 0 : i32
    %c0_i32_0 = arith.constant 0 : i32
    %c0_i32_1 = arith.constant 0 : i32
    return %c0_i32, %c0_i32_0 : i32, i32
  }
  func.func @transform_3(%arg0: i32) -> (i32, i32) {
    %c0_i32 = arith.constant 0 : i32
    %c0_i32_0 = arith.constant 0 : i32
    %c0_i32_1 = arith.constant 0 : i32
    return %c0_i32, %c0_i32_0 : i32, i32
  }
  func.func @transform_4(%arg0: i32) -> (i32, i32) {
    %c0_i32 = arith.constant 0 : i32
    %c0_i32_0 = arith.constant 0 : i32
    %c0_i32_1 = arith.constant 0 : i32
    return %c0_i32, %c0_i32_0 : i32, i32
  }
  func.func @transform_5(%arg0: i32) -> (i32, i32) {
    %c0_i32 = arith.constant 0 : i32
    %c0_i32_0 = arith.constant 0 : i32
    %c0_i32_1 = arith.constant 0 : i32
    return %c0_i32, %c0_i32_0 : i32, i32
  }
  func.func @transform_6(%arg0: i32) -> (i32, i32, i32) {
    %c0_i32 = arith.constant 0 : i32
    %c0_i32_0 = arith.constant 0 : i32
    %c0_i32_1 = arith.constant 0 : i32
    return %arg0, %c0_i32, %c0_i32_0 : i32, i32, i32
  }
}

</mosaic_0001>

<bundles_post_ra>
// kernel: conv2x_forward.1
= control target key start
LH: loop header
LB: loop body
LE: loop exit
PB: predicated region body
PF: predicated region fallthrough
CT: control target
= control target key end

     0   :  { %s2690_s21 = smov 0   ;;  %s3560_s0 = inlined_call_operand.vmem [shape: bf16[2,4,9,9,4], index: 0, kind: input, shape index: {}]   ;;  %s3561_s1 = inlined_call_operand.vmem [shape: bf16[2,8,8,8], index: 1, kind: input, shape index: {}]   ;;  %s3562_s2 = inlined_call_operand.vmem [shape: bf16[36,8], index: 2, kind: input, shape index: {}]   ;;  %s3563_s3 = inlined_call_operand.vmem [shape: bf16[8,144], index: 3, kind: input, shape index: {}]   ;;  %s3564_s4 = inlined_call_operand.vmem [shape: f32[1,8], index: 4, kind: input, shape index: {}]   ;;  %s3565_s5 = inlined_call_operand.vmem [shape: f32[8,1], index: 5, kind: input, shape index: {}]   ;;  %s3566_s6 = inlined_call_operand.vmem [shape: bf16[2,8,64], index: 6, kind: output, shape index: {}]  }
   0x1 LB: > { %s2341_s22 = sadd.s32 4294967295, %s2639_s21   ;;  %p2345_p0 = scmp.ge.s32.totalorder %s2639_s21, 1  ;;  %s2639_s21 = sphi %s2690_s21, %s16_s21  }
   0x2   : > { %p222_p1 = scmp.lt.s32.totalorder %s2639_s21, 3 }
   0x4   : > { %p223_p2 = pnand %p2345_p0, %p222_p1 }
   0x5   : > { %p256_p3 = scmp.lt.s32.totalorder (!%p223_p2), %s2341_s22, 1  ;;  %s2641_s27 = smov (!%p223_p2), 4   ;;  %vm296_vm0 = vsmask.f32 (!%p223_p2), 3328  ;;  %vm297_vm1 = vsmask.f32 (!%p223_p2), 7440 }
   0x6   : > { %226 = sbr.rel (%p223_p2) target bundleno = 840 (0x348), region = 44  ;;  %s2642_s28 = smov (!%p223_p2), 12   ;;  %vm2749_vm2 = vmor (!%p223_p2), %vm296_vm0, %vm297_vm1  ;;  %vm1019_vm3 = vcmask (!%p223_p2), 1041408   ;;  %vm907_vm4 = vcmask (!%p223_p2), 31744   ;;  %vm920_vm5 = vcmask (!%p223_p2), 64512   ;;  %vm929_vm6 = vcmask (!%p223_p2), 97280  }
   0x7   : > { %s2643_s29 = smov (!%p223_p2), 16   ;;  %s2644_s8 = smov (!%p223_p2), 8   ;;  %vm938_vm7 = vcmask (!%p223_p2), 130048   ;;  %vm947_vm8 = vcmask (!%p223_p2), 162816   ;;  %vm956_vm9 = vcmask (!%p223_p2), 195584   ;;  %vm965_vm10 = vcmask (!%p223_p2), 228352  }
   0x8   : > { %s2645_s11 = smov (!%p223_p2), 20   ;;  %s2646_s12 = smov (!%p223_p2), 24   ;;  %vm974_vm11 = vcmask (!%p223_p2), 261120   ;;  %vm1010_vm12 = vcmask (!%p223_p2), 293888   ;;  %vm1098_vm13 = vcmask (!%p223_p2), 122880   ;;  %vm1096_vm0 = vcmask (!%p223_p2), 125952  }
   0x9   : > { %s2647_s13 = smov (!%p223_p2), 28   ;;  %s2648_s14 = smov (!%p223_p2), 32   ;;  %vm1105_vm14 = vsmask.f32 (!%p223_p2), 256  ;;  %vm1131_vm15 = vsmask.f32 (!%p223_p2), 7938 }
   0xa   : > { %vm3012_vm1 = vmand (!%p223_p2), %vm1098_vm13, %vm1105_vm14  ;;  %s2650_s25 = smov (!%p223_p2), 48   ;;  %s2654_s30 = smov (!%p223_p2), 112   ;;  %v2205_v56 = vld [vmem:[%s3565_s5] sm:$0xff] (!%p223_p2) }
   0xd   : > { %s3582_s22 = smov (!%p256_p3, %s2341_s22), 1 }
   0xe   : > { %s2558_s23 = smul.u32 288, %s3582_s22  ;;  %s2535_s17 = sshll.u32 %s3582_s22, 5 }
   0xf   : > { %s2932_s20 = scalar_lea.vmem %s3561_s1, %s2535_s17  ;;  %s2349_s10 = sshll.u32 %s3582_s22, 2 }
  0x10   : > { %s2704_s26 = scalar_lea.vmem %s3560_s0, %s2558_s23 }
  0x11   : > { %v2582_v0 = vld [vmem:[%s2704_s26 + $0x48] ss:$8 sps:$4 sm:$0xff]   ;;  %v2360_v1 = vld [vmem:[%s2704_s26 + $0xa0] sm:$0xf]  ;;  %v2359_v16 = vld [vmem:[%s2704_s26 + $0x98] sm:$0xf] }
  0x12   : > { %v2361_v2 = vld [vmem:[%s2704_s26 + $0xa8] sm:$0xf]  ;;  %727 = vrot.lane.b32.xlu0 %v2582_v0, %s2641_s27  ;;  %v466_v6 = vshrl.u32 %v2360_v1, 16  ;;  %v469_v7 = vshll.u32 %v2360_v1, 16  ;;  %v2584_v8 = vld [vmem:[%s2704_s26 + $0x58] ss:$8 sps:$4 sm:$0xff]  }
  0x13   : > { %v480_v3 = vshrl.u32 %v2361_v2, 16  ;;  %v483_v4 = vshll.u32 %v2361_v2, 16  ;;  %v2419_v5 = vcombine.low %v2360_v1, %v2361_v2  ;;  %v2585_v13 = vld [vmem:[%s2704_s26 + $0xe8] ss:$8 sps:$4 sm:$0xff]   ;;  %v2717_v19 = vld [vmem:[%s2704_s26] sm:$0xf] }
  0x14   : > { %v468_v11 = vrot.slane %v466_v6, 4  ;;  %v471_v12 = vrot.slane %v469_v7, 5  ;;  %v2358_v14 = vld [vmem:[%s2704_s26 + $0x90] sm:$0xf]  ;;  %v452_v21 = vshrl.u32 %v2359_v16, 16  ;;  %v455_v22 = vshll.u32 %v2359_v16, 16 }
  0x15   : > { %v482_v9 = vrot.slane %v480_v3, 4  ;;  %v485_v10 = vrot.slane %v483_v4, 5  ;;  %777 = vrot.lane.b32.xlu1 %v2419_v5, %s2642_s28  ;;  %v438_v17 = vshrl.u32 %v2358_v14, 16  ;;  %v441_v18 = vshll.u32 %v2358_v14, 16  ;;  %v2720_v24 = vld [vmem:[%s2704_s26 + $0x8] sm:$0xf] }
  0x16   : > { %729 = vrot.lane.b32.xlu0 %v2584_v8, %s2641_s27  ;;  %v472_v20 = vor.u32 %v471_v12, %v468_v11  ;;  %v2418_v23 = vcombine.low %v2358_v14, %v2359_v16  ;;  %v288_v25 = vld [vmem:[%s2704_s26 + $0x4] sm:$0x1]  ;;  %v289_v29 = vld [vmem:[%s2704_s26 + $0xc] sm:$0x1]  ;;  %v300_v30 = vshrl.u32 %v2717_v19, 16  ;;  %v454_v32 = vrot.slane %v452_v21, 4 }
  0x17   : > { %v486_v15 = vor.u32 %v485_v10, %v482_v9  ;;  %v440_v27 = vrot.slane %v438_v17, 4  ;;  %v443_v28 = vrot.slane %v441_v18, 5  ;;  %v457_v33 = vrot.slane %v455_v22, 5  ;;  %v2587_v41 = vld [vmem:[%s2704_s26 + $0xd8] ss:$8 sps:$4 sm:$0xff]  }
  0x18   : > { %v2728_v31 = vrot.slane %v472_v20, 4  ;;  %v303_v34 = vshll.u32 %v2717_v19, 16  ;;  %v302_v35 = vrot.slane %v300_v30, 4  ;;  %v309_v36 = vshll.u32 %v288_v25, 16  ;;  %v2736_v42 = vld [vmem:[%s2704_s26 + $0x10] sm:$0xf] }
  0x19   : > { %v2723_v26 = vrot.slane %v486_v15, 4  ;;  %805 = vrot.lane.b32.xlu1 %v2585_v13, %s2643_s29  ;;  %v314_v37 = vshrl.u32 %v2720_v24, 16  ;;  %v317_v38 = vshll.u32 %v2720_v24, 16  ;;  %v323_v40 = vshll.u32 %v289_v29, 16  ;;  %v2739_v48 = vld [vmem:[%s2704_s26 + $0x18] sm:$0xf] }
  0x1a   : > { %775 = vrot.lane.b32.xlu0 %v2418_v23, %s2642_s28  ;;  %v305_v39 = vrot.slane %v303_v34, 5  ;;  %v444_v43 = vor.u32 %v443_v28, %v440_v27  ;;  %v458_v44 = vor.u32 %v457_v33, %v454_v32  ;;  %v311_v45 = vrot.slane %v309_v36, 5  ;;  %v290_v52 = vld [vmem:[%s2704_s26 + $0x14] sm:$0x1]  ;;  %v291_v53 = vld [vmem:[%s2704_s26 + $0x1c] sm:$0x1] }
  0x1b   : > { %v316_v46 = vrot.slane %v314_v37, 4  ;;  %v319_v47 = vrot.slane %v317_v38, 5  ;;  %v328_v49 = vshrl.u32 %v2736_v42, 16  ;;  %v325_v51 = vrot.slane %v323_v40, 5  ;;  %v2374_v61 = vld [vmem:[%s2704_s26 + $0x94] sm:$0x1] }
  0x1c   : > { %v306_v50 = vor.u32 %v305_v39, %v302_v35  ;;  %v331_v54 = vshll.u32 %v2736_v42, 16  ;;  %v2406_v55 = vcombine.low %v2717_v19, %v2720_v24  ;;  %v337_v59 = vshll.u32 %v290_v52, 16  ;;  %v2375_v2 = vld [vmem:[%s2704_s26 + $0x9c] sm:$0x1]  ;;  %v2376_v7 = vld [vmem:[%s2704_s26 + $0xa4] sm:$0x1] }
  0x1d   : > { %v320_v57 = vor.u32 %v319_v47, %v316_v46  ;;  %v330_v58 = vrot.slane %v328_v49, 4  ;;  %v342_v60 = vshrl.u32 %v2739_v48, 16  ;;  %v345_v0 = vshll.u32 %v2739_v48, 16  ;;  %v2377_v12 = vld [vmem:[%s2704_s26 + $0xac] sm:$0x1]  ;;  %v2604_v18 = vld [vmem:[%s3562_s2] sm:$0xff]  }
  0x1e   : > { %803 = vrot.lane.b32.xlu0 %v2587_v41, %s2643_s29  ;;  %v307_v62 = vrot.slane %v306_v50, 4  ;;  %v333_v63 = vrot.slane %v331_v54, 5  ;;  %v351_v1 = vshll.u32 %v291_v53, 16  ;;  %v339_v4 = vrot.slane %v337_v59, 5  ;;  %v2763_v13 = vld [vmem:[%s2704_s26 + $0x8] sm:$0xf]  ;;  %2543 = vmatprep.subr.bf16.mxu0 %v2604_v18 }
  0x1f   : > { %v321_v3 = vrot.slane %v320_v57, 4  ;;  %v344_v5 = vrot.slane %v342_v60, 4  ;;  %v445_v6 = vrot.slane %v444_v43, 4  ;;  %v347_v10 = vrot.slane %v345_v0, 5  ;;  %v2383_v25 = vld [vmem:[%s2704_s26 + $0x10] sm:$0xf]  ;;  %2544 = vmatpush3.bf16.msra.mxu0 %v2604_v18 }
  0x20   : > { %v312_v8 = vsel %vm2749_vm2, %v307_v62, %v311_v45  ;;  %v334_v9 = vor.u32 %v333_v63, %v330_v58  ;;  %v353_v11 = vrot.slane %v351_v1, 5  ;;  %v447_v15 = vshll.u32 %v2374_v61, 16  ;;  %v2605_v36 = vld [vmem:[%s3562_s2 + $0x8] sm:$0xff]   ;;  %v2784_v41 = vld [vmem:[%s2704_s26 + $0x18] sm:$0xf] }
  0x21   : > { %v326_v14 = vsel %vm2749_vm2, %v321_v3, %v325_v51  ;;  %v459_v16 = vrot.slane %v458_v44, 4  ;;  %v461_v17 = vshll.u32 %v2375_v2, 16  ;;  %v348_v22 = vor.u32 %v347_v10, %v344_v5  ;;  %v2385_v47 = vld [vmem:[%s2704_s26 + $0x20] sm:$0xf]  ;;  %2545 = vmatprep.subr.bf16.mxu0 %v2605_v36  ;;  %v2398_v53 = vld [vmem:[%s2704_s26 + $0xc] sm:$0x1] }
  0x22   : > { %v2414_v20 = vcombine.low %v312_v8, %v326_v14  ;;  %v335_v21 = vrot.slane %v334_v9, 4  ;;  %v475_v23 = vshll.u32 %v2376_v7, 16  ;;  %v449_v27 = vrot.slane %v447_v15, 5  ;;  %v2399_v59 = vld [vmem:[%s2704_s26 + $0x14] sm:$0x1] }
  0x23   : > { %v463_v28 = vrot.slane %v461_v17, 5  ;;  %v489_v29 = vshll.u32 %v2377_v12, 16  ;;  %v576_v30 = vshrl.u32 %v2763_v13, 16  ;;  %v349_v33 = vrot.slane %v348_v22, 4  ;;  %v2400_v60 = vld [vmem:[%s2704_s26 + $0x1c] sm:$0x1]  ;;  %2546 = vmatpush3.bf16.msra.mxu0 %v2605_v36 }
  0x24   : > { %747 = vrot.lane.b32.xlu1 %v2414_v20, %s2644_s8  ;;  %v340_v32 = vsel %vm2749_vm2, %v335_v21, %v339_v4  ;;  %v477_v34 = vrot.slane %v475_v23, 5  ;;  %v579_v35 = vshll.u32 %v2763_v13, 16  ;;  %v450_v37 = vsel %vm2749_vm2, %v445_v6, %v449_v27  ;;  %v2590_v3 = vld [vmem:[%s2704_s26 + $0x50] ss:$8 sps:$4 sm:$0xff]   ;;  %v2401_v5 = vld [vmem:[%s2704_s26 + $0x24] sm:$0x1] }
  0x25   : > { %v464_v38 = vsel %vm2749_vm2, %v459_v16, %v463_v28  ;;  %v491_v39 = vrot.slane %v489_v29, 5  ;;  %v578_v40 = vrot.slane %v576_v30, 4  ;;  %v354_v43 = vsel %vm2749_vm2, %v349_v33, %v353_v11  ;;  %v2809_v22 = vld [vmem:[%s2704_s26 + $0x20] sm:$0xf]  ;;  %v2816_v29 = vld [vmem:[%s2704_s26 + $0x28] sm:$0xf] }
  0x26   : > { %v2426_v44 = vcombine.low %v450_v37, %v464_v38  ;;  %v478_v45 = vsel %vm2749_vm2, %v2728_v31, %v477_v34  ;;  %v581_v46 = vrot.slane %v579_v35, 5  ;;  %v2415_v49 = vcombine.low %v340_v32, %v354_v43  ;;  %v292_v30 = vld [vmem:[%s2704_s26 + $0x24] sm:$0x1]  ;;  %v293_v34 = vld [vmem:[%s2704_s26 + $0x2c] sm:$0x1] }
  0x27   : > { %v492_v50 = vsel %vm2749_vm2, %v2723_v26, %v491_v39  ;;  %v590_v51 = vshrl.u32 %v2383_v25, 16  ;;  %v593_v52 = vshll.u32 %v2383_v25, 16  ;;  %v2430_v57 = vcombine.low %v2763_v13, %v2383_v25  ;;  %v2828_v37 = vld [vmem:[%s2704_s26 + $0x30] sm:$0xf]  ;;  %v2591_v38 = vld [vmem:[%s2704_s26 + $0x60] ss:$8 sps:$4 sm:$0xff]  }
  0x28   : > { %823 = vrot.lane.b32.xlu0 %v2426_v44, %s2645_s11  ;;  %v2427_v54 = vcombine.low %v478_v45, %v492_v50  ;;  %v604_v31 = vshrl.u32 %v2784_v41, 16  ;;  %v607_v58 = vshll.u32 %v2784_v41, 16  ;;  %749 = vrot.lane.b32.xlu1 %v2415_v49, %s2644_s8  ;;  %v618_v62 = vshrl.u32 %v2385_v47, 16  ;;  %v294_v44 = vld [vmem:[%s2704_s26 + $0x34] sm:$0x1] }
  0x29   : > { %v592_v26 = vrot.slane %v590_v51, 4  ;;  %v595_v61 = vrot.slane %v593_v52, 5  ;;  %v621_v63 = vshll.u32 %v2385_v47, 16  ;;  %v2431_v2 = vcombine.low %v2784_v41, %v2385_v47  ;;  %v2839_v51 = vld [vmem:[%s2704_s26 + $0x38] sm:$0xf] }
  0x2a   : > { %v606_v0 = vrot.slane %v604_v31, 4  ;;  %v609_v1 = vrot.slane %v607_v58, 5  ;;  %v582_v4 = vor.u32 %v581_v46, %v578_v40  ;;  %v620_v6 = vrot.slane %v618_v62, 4  ;;  %v2592_v46 = vld [vmem:[%s2704_s26 + $0x68] ss:$8 sps:$4 sm:$0xff]  }
  0x2b   : > { %v623_v7 = vrot.slane %v621_v63, 5  ;;  %v585_v8 = vshll.u32 %v2398_v53, 16  ;;  %v596_v9 = vor.u32 %v595_v61, %v592_v26  ;;  %v599_v11 = vshll.u32 %v2399_v59, 16  ;;  %v2846_v61 = vld [vmem:[%s2704_s26 + $0xb0] sm:$0xf] }
  0x2c   : > { %851 = vrot.lane.b32.xlu0 %v2430_v57, %s2646_s12  ;;  %v583_v10 = vrot.slane %v582_v4, 4  ;;  %v610_v12 = vor.u32 %v609_v1, %v606_v0  ;;  %v613_v13 = vshll.u32 %v2400_v60, 16  ;;  %825 = vrot.lane.b32.xlu1 %v2427_v54, %s2645_s11  ;;  %v627_v17 = vshll.u32 %v2401_v5, 16  ;;  %v295_v57 = vld [vmem:[%s2704_s26 + $0x3c] sm:$0x1] }
  0x2d   : > { %v587_v14 = vrot.slane %v585_v8, 5  ;;  %v597_v15 = vrot.slane %v596_v9, 4  ;;  %v624_v16 = vor.u32 %v623_v7, %v620_v6  ;;  %v601_v18 = vrot.slane %v599_v11, 5  ;;  %v2363_v6 = vld [vmem:[%s2704_s26 + $0xb8] sm:$0xf] }
  0x2e   : > { %v611_v20 = vrot.slane %v610_v12, 4  ;;  %v615_v21 = vrot.slane %v613_v13, 5  ;;  %v2407_v23 = vcombine.low %v2736_v42, %v2739_v48  ;;  %v629_v28 = vrot.slane %v627_v17, 5  ;;  %v2593_v7 = vld [vmem:[%s2704_s26 + $0x78] ss:$8 sps:$4 sm:$0xff]  }
  0x2f   : > { %v588_v25 = vsel %vm2749_vm2, %v583_v10, %v587_v14  ;;  %v625_v27 = vrot.slane %v624_v16, 4  ;;  %v602_v32 = vsel %vm2749_vm2, %v597_v15, %v601_v18  ;;  %v356_v35 = vshrl.u32 %v2809_v22, 16  ;;  %v2855_v12 = vld [vmem:[%s2704_s26 + $0xc0] sm:$0xf]  ;;  %v2862_v17 = vld [vmem:[%s2704_s26 + $0xc8] sm:$0xf] }
  0x30   : > { %879 = vrot.lane.b32.xlu0 %v2590_v3, %s2647_s13  ;;  %v616_v33 = vsel %vm2749_vm2, %v611_v20, %v615_v21  ;;  %v359_v36 = vshll.u32 %v2809_v22, 16  ;;  %853 = vrot.lane.b32.xlu1 %v2431_v2, %s2646_s12  ;;  %v2438_v39 = vcombine.low %v588_v25, %v602_v32  ;;  %v365_v41 = vshll.u32 %v292_v30, 16 }
  0x31   : > { %v630_v40 = vsel %vm2749_vm2, %v625_v27, %v629_v28  ;;  %v370_v43 = vshrl.u32 %v2816_v29, 16  ;;  %v358_v47 = vrot.slane %v356_v35, 4  ;;  %v373_v50 = vshll.u32 %v2816_v29, 16 }
  0x32   : > { %v2439_v45 = vcombine.low %v616_v33, %v630_v40  ;;  %v361_v49 = vrot.slane %v359_v36, 5  ;;  %v367_v52 = vrot.slane %v365_v41, 5  ;;  %v379_v54 = vshll.u32 %v293_v34, 16 }
  0x33   : > { %v372_v53 = vrot.slane %v370_v43, 4  ;;  %v384_v31 = vshrl.u32 %v2828_v37, 16  ;;  %v375_v59 = vrot.slane %v373_v50, 5  ;;  %v387_v60 = vshll.u32 %v2828_v37, 16  ;;  %v2378_v43 = vld [vmem:[%s2704_s26 + $0xb4] sm:$0x1] }
  0x34   : > { %899 = vrot.lane.b32.xlu0 %v2438_v39, %s2648_s14  ;;  %v362_v58 = vor.u32 %v361_v49, %v358_v47  ;;  %v393_v26 = vshll.u32 %v294_v44, 16  ;;  %881 = vrot.lane.b32.xlu1 %v2591_v38, %s2647_s13  ;;  %v381_v62 = vrot.slane %v379_v54, 5  ;;  %v398_v0 = vshrl.u32 %v2839_v51, 16  ;;  %v2379_v49 = vld [vmem:[%s2704_s26 + $0xbc] sm:$0x1] }
  0x35   : > { %v386_v63 = vrot.slane %v384_v31, 4  ;;  %v401_v1 = vshll.u32 %v2839_v51, 16  ;;  %v376_v3 = vor.u32 %v375_v59, %v372_v53  ;;  %v389_v4 = vrot.slane %v387_v60, 5  ;;  %v2380_v50 = vld [vmem:[%s2704_s26 + $0xc4] sm:$0x1] }
  0x36   : > { %v363_v2 = vrot.slane %v362_v58, 4  ;;  %v395_v5 = vrot.slane %v393_v26, 5  ;;  %v400_v8 = vrot.slane %v398_v0, 4  ;;  %v407_v10 = vshll.u32 %v295_v57, 16  ;;  %v2381_v31 = vld [vmem:[%s2704_s26 + $0xcc] sm:$0x1] }
  0x37   : > { %v403_v9 = vrot.slane %v401_v1, 5  ;;  %v494_v11 = vshrl.u32 %v2846_v61, 16  ;;  %v377_v14 = vrot.slane %v376_v3, 4  ;;  %v390_v15 = vor.u32 %v389_v4, %v386_v63  ;;  %v2596_v60 = vld [vmem:[%s2704_s26 + $0xf8] ss:$8 sps:$4 sm:$0xff]  }
  0x38   : > { %731 = vrot.lane.b32.xlu0 %v2592_v46, %s2641_s27  ;;  %v368_v13 = vsel %vm2749_vm2, %v363_v2, %v367_v52  ;;  %v497_v16 = vshll.u32 %v2846_v61, 16  ;;  %901 = vrot.lane.b32.xlu1 %v2439_v45, %s2648_s14  ;;  %v409_v20 = vrot.slane %v407_v10, 5  ;;  %v508_v25 = vshrl.u32 %v2363_v6, 16  ;;  %v2387_v3 = vld [vmem:[%s2704_s26 + $0x30] sm:$0xf] }
  0x39   : > { %v404_v18 = vor.u32 %v403_v9, %v400_v8  ;;  %v496_v21 = vrot.slane %v494_v11, 4  ;;  %v382_v27 = vsel %vm2749_vm2, %v377_v14, %v381_v62  ;;  %v391_v28 = vrot.slane %v390_v15, 4  ;;  %v2886_v62 = vld [vmem:[%s2704_s26 + $0x28] sm:$0xf]  ;;  %v2892_v8 = vld [vmem:[%s2704_s26 + $0x38] sm:$0xf] }
  0x3a   : > { %v499_v30 = vrot.slane %v497_v16, 5  ;;  %v511_v32 = vshll.u32 %v2363_v6, 16  ;;  %v2416_v33 = vcombine.low %v368_v13, %v382_v27  ;;  %v510_v35 = vrot.slane %v508_v25, 4  ;;  %v2597_v27 = vld [vmem:[%s2704_s26 + $0x108] ss:$8 sps:$4 sm:$0xff]  }
  0x3b   : > { %v405_v34 = vrot.slane %v404_v18, 4  ;;  %v2420_v36 = vcombine.low %v2846_v61, %v2363_v6  ;;  %v396_v38 = vsel %vm2749_vm2, %v391_v28, %v395_v5  ;;  %v522_v40 = vshrl.u32 %v2855_v12, 16 }
  0x3c   : > { %v513_v39 = vrot.slane %v511_v32, 5  ;;  %v525_v41 = vshll.u32 %v2855_v12, 16  ;;  %733 = vrot.lane.b32.xlu1 %v2593_v7, %s2641_s27  ;;  %751 = vrot.lane.b32.xlu0 %v2416_v33, %s2644_s8  ;;  %v536_v45 = vshrl.u32 %v2862_v17, 16  ;;  %v539_v46 = vshll.u32 %v2862_v17, 16  ;;  %s2652_s27 = smov 80  }
  0x3d   : > { %v410_v44 = vsel %vm2749_vm2, %v405_v34, %v409_v20  ;;  %v2421_v47 = vcombine.low %v2855_v12, %v2862_v17  ;;  %v524_v53 = vrot.slane %v522_v40, 4  ;;  %v500_v57 = vor.u32 %v499_v30, %v496_v21  ;;  %v2389_v17 = vld [vmem:[%s2704_s26 + $0x40] sm:$0xf]  ;;  %v2402_v34 = vld [vmem:[%s2704_s26 + $0x2c] sm:$0x1] }
  0x3e   : > { %v2417_v52 = vcombine.low %v396_v38, %v410_v44  ;;  %v527_v54 = vrot.slane %v525_v41, 5  ;;  %v538_v58 = vrot.slane %v536_v45, 4  ;;  %v541_v59 = vrot.slane %v539_v46, 5  ;;  %v2404_v45 = vld [vmem:[%s2704_s26 + $0x3c] sm:$0x1] }
  0x3f   : > { %v503_v26 = vshll.u32 %v2378_v43, 16  ;;  %v514_v61 = vor.u32 %v513_v39, %v510_v35  ;;  %v501_v63 = vrot.slane %v500_v57, 4  ;;  %v517_v0 = vshll.u32 %v2379_v49, 16  ;;  %v2403_v39 = vld [vmem:[%s2704_s26 + $0x34] sm:$0x1] }
  0x40   : > { %v528_v1 = vor.u32 %v527_v54, %v524_v53  ;;  %v531_v2 = vshll.u32 %v2380_v50, 16  ;;  %753 = vrot.lane.b32.xlu1 %v2417_v52, %s2644_s8  ;;  %779 = vrot.lane.b32.xlu0 %v2420_v36, %s2642_s28  ;;  %v542_v6 = vor.u32 %v541_v59, %v538_v58  ;;  %v545_v7 = vshll.u32 %v2381_v31, 16  ;;  %v2405_v52 = vld [vmem:[%s2704_s26 + $0x44] sm:$0x1] }
  0x41   : > { %v505_v4 = vrot.slane %v503_v26, 5  ;;  %v515_v5 = vrot.slane %v514_v61, 4  ;;  %v519_v9 = vrot.slane %v517_v0, 5  ;;  %v632_v12 = vshrl.u32 %v2886_v62, 16 }
  0x42   : > { %v529_v10 = vrot.slane %v528_v1, 4  ;;  %v533_v11 = vrot.slane %v531_v2, 5  ;;  %v543_v14 = vrot.slane %v542_v6, 4  ;;  %v547_v15 = vrot.slane %v545_v7, 5 }
  0x43   : > { %v506_v13 = vsel %vm2749_vm2, %v501_v63, %v505_v4  ;;  %v635_v16 = vshll.u32 %v2886_v62, 16  ;;  %v520_v18 = vsel %vm2749_vm2, %v515_v5, %v519_v9  ;;  %v634_v21 = vrot.slane %v632_v12, 4  ;;  %v2606_v2 = vld [vmem:[%s3562_s2 + $0x10] ss:$0 sps:$4 sm:$0x33]  }
  0x44   : > { %v534_v20 = vsel %vm2749_vm2, %v529_v10, %v533_v11  ;;  %v646_v25 = vshrl.u32 %v2387_v3, 16  ;;  %781 = vrot.lane.b32.xlu1 %v2421_v47, %s2642_s28  ;;  %807 = vrot.lane.b32.xlu0 %v2596_v60, %s2643_s29  ;;  %v2428_v28 = vcombine.low %v506_v13, %v520_v18  ;;  %v548_v30 = vsel %vm2749_vm2, %v543_v14, %v547_v15  ;;  %v2600_v4 = vld [vmem:[%s2704_s26 + $0x70] ss:$8 sps:$4 sm:$0xff]   ;;  %v2601_v12 = vld [vmem:[%s2704_s26 + $0x80] ss:$8 sps:$4 sm:$0xff]   ;;  %s2651_s26 = smov 96  }
  0x45   : > { %v637_v32 = vrot.slane %v635_v16, 5  ;;  %v649_v33 = vshll.u32 %v2387_v3, 16  ;;  %v2429_v35 = vcombine.low %v534_v20, %v548_v30  ;;  %v660_v38 = vshrl.u32 %v2892_v8, 16  ;;  %2557 = vmatprep.subr.msk.bf16.mxu0 %vm1019_vm3, %v2606_v2  ;;  %v2609_v20 = vld [vmem:[%s2932_s20] ss:$0 sps:$4 sm:$0xff]   ;;  %s2653_s28 = smov 64  }
  0x46   : > { %v648_v36 = vrot.slane %v646_v25, 4  ;;  %v663_v41 = vshll.u32 %v2892_v8, 16  ;;  %v674_v43 = vshrl.u32 %v2389_v17, 16  ;;  %v677_v44 = vshll.u32 %v2389_v17, 16  ;;  %v2611_v25 = vld [vmem:[%s2932_s20 + $0x8] ss:$0 sps:$4 sm:$0xff]  }
  0x47   : > { %v651_v40 = vrot.slane %v649_v33, 5  ;;  %v2432_v46 = vcombine.low %v2886_v62, %v2387_v3  ;;  %v662_v47 = vrot.slane %v660_v38, 4  ;;  %v638_v49 = vor.u32 %v637_v32, %v634_v21  ;;  %v2610_v21 = vld [vmem:[%s2932_s20 + $0x4] ss:$0 sps:$4 sm:$0xff]   ;;  %v2614_v30 = vld [vmem:[%s2932_s20 + $0x14] ss:$0 sps:$4 sm:$0xff]  }
  0x48   : > { %v641_v50 = vshll.u32 %v2402_v34, 16  ;;  %809 = vrot.lane.b32.xlu1 %v2597_v27, %s2643_s29  ;;  %827 = vrot.lane.b32.xlu0 %v2428_v28, %s2645_s11  ;;  %v665_v53 = vrot.slane %v663_v41, 5  ;;  %v676_v54 = vrot.slane %v674_v43, 4  ;;  %v679_v57 = vrot.slane %v677_v44, 5  ;;  %v2612_v27 = vld [vmem:[%s2932_s20 + $0xc] ss:$0 sps:$4 sm:$0xff]  }
  0x49   : > { %v652_v31 = vor.u32 %v651_v40, %v648_v36  ;;  %v639_v58 = vrot.slane %v638_v49, 4  ;;  %v655_v60 = vshll.u32 %v2403_v39, 16  ;;  %v669_v26 = vshll.u32 %v2404_v45, 16  ;;  %v2613_v28 = vld [vmem:[%s2932_s20 + $0x10] ss:$0 sps:$4 sm:$0xff]  }
  0x4a   : > { %v643_v59 = vrot.slane %v641_v50, 5  ;;  %v666_v62 = vor.u32 %v665_v53, %v662_v47  ;;  %v680_v63 = vor.u32 %v679_v57, %v676_v54  ;;  %v683_v0 = vshll.u32 %v2405_v52, 16  ;;  %v2615_v32 = vld [vmem:[%s2932_s20 + $0x18] ss:$0 sps:$4 sm:$0xff]   ;;  %v2616_v33 = vld [vmem:[%s2932_s20 + $0x1c] ss:$0 sps:$4 sm:$0xff]  }
  0x4b   : > { %v653_v61 = vrot.slane %v652_v31, 4  ;;  %v657_v1 = vrot.slane %v655_v60, 5  ;;  %v2433_v3 = vcombine.low %v2892_v8, %v2389_v17  ;;  %v671_v6 = vrot.slane %v669_v26, 5 }
  0x4c   : > { %829 = vrot.lane.b32.xlu1 %v2429_v35, %s2645_s11  ;;  %855 = vrot.lane.b32.xlu0 %v2432_v46, %s2646_s12  ;;  %v644_v5 = vsel %vm2749_vm2, %v639_v58, %v643_v59  ;;  %v667_v9 = vrot.slane %v666_v62, 4  ;;  %v681_v10 = vrot.slane %v680_v63, 4  ;;  %v685_v11 = vrot.slane %v683_v0, 5 }
  0x4d   : > { %v658_v7 = vsel %vm2749_vm2, %v653_v61, %v657_v1  ;;  %v1021_v8 = vsel %vm1019_vm3, %v2606_v2, 0  ;;  %v2408_v14 = vcombine.low %v2809_v22, %v2816_v29  ;;  %v2409_v15 = vcombine.low %v2828_v37, %v2839_v51  ;;  %vm3021_vm3 = vmand %vm1098_vm13, %vm1131_vm15 }
  0x4e   : > { %v2440_v13 = vcombine.low %v644_v5, %v658_v7  ;;  %v672_v16 = vsel %vm2749_vm2, %v667_v9, %v671_v6  ;;  %v686_v17 = vsel %vm2749_vm2, %v681_v10, %v685_v11  ;;  %2548 = vmatpush3.bf16.msra.mxu0 %v1021_v8 }
  0x4f   : > { %v2441_v18 = vcombine.low %v672_v16, %v686_v17 }
  0x50   : > { %857 = vrot.lane.b32.xlu1 %v2433_v3, %s2646_s12  ;;  %883 = vrot.lane.b32.xlu0 %v2600_v4, %s2647_s13 }
  0x54   : > { %885 = vrot.lane.b32.xlu1 %v2601_v12, %s2647_s13  ;;  %903 = vrot.lane.b32.xlu0 %v2440_v13, %s2648_s14  ;;  %s269_s13 = scalar_lea.vmem %s3566_s6, %s2349_s10 }
  0x58   : > { %905 = vrot.lane.b32.xlu1 %v2441_v18, %s2648_s14  ;;  %1197 = vrot.lane.b32.xlu0 %v2609_v20, %s2644_s8 }
  0x5c   : > { %1199 = vrot.lane.b32.xlu1 %v2610_v21, %s2644_s8  ;;  %1201 = vrot.lane.b32.xlu0 %v2611_v25, %s2644_s8 }
  0x60   : > { %1203 = vrot.lane.b32.xlu1 %v2612_v27, %s2644_s8  ;;  %1205 = vrot.lane.b32.xlu0 %v2613_v28, %s2644_s8 }
  0x64   : > { %1207 = vrot.lane.b32.xlu1 %v2614_v30, %s2644_s8  ;;  %1209 = vrot.lane.b32.xlu0 %v2615_v32, %s2644_s8 }
  0x68   : > { %1211 = vrot.lane.b32.xlu1 %v2616_v33, %s2644_s8 }
  0x84   : > { %v728_v34 = vpop.permute.xlu0 %727 }
  0x85   : > { %v910_v45 = vsel %vm907_vm4, %v2406_v55, %v728_v34 }
  0x87   : > { %v778_v36 = vpop.permute.xlu1 %777 }
  0x88   : > { %v730_v35 = vpop.permute.xlu0 %729 }
  0x89   : > { %v913_v49 = vsel %vm907_vm4, %v2407_v23, %v730_v35 }
  0x8b   : > { %v806_v39 = vpop.permute.xlu1 %805 }
  0x8c   : > { %v776_v38 = vpop.permute.xlu0 %775 }
  0x90   : > { %v804_v40 = vpop.permute.xlu0 %803 }
  0x96   : > { %v748_v41 = vpop.permute.xlu1 %747 }
  0x97   : > { %v922_v46 = vsel %vm920_vm5, %v910_v45, %v748_v41 }
  0x98   : > { %v931_v52 = vsel %vm929_vm6, %v922_v46, %v776_v38  ;;  %v1133_v38 = vld [vmem:[#allocation2 + $0xc] sm:$0x1] }
  0x99   : > { %v940_v24 = vsel %vm938_vm7, %v931_v52, %v804_v40  ;;  %v1134_v45 = vsel %vm3021_vm3, 0, %v1133_v38  ;;  %v1110_v52 = vld [vmem:[#allocation2 + $0x10] sm:$0x1] }
  0x9a   : > { %v824_v43 = vpop.permute.xlu0 %823  ;;  %v750_v44 = vpop.permute.xlu1 %749  ;;  %1135 = vst [vmem:[#allocation2 + $0xc] sm:$0x1] %v1134_v45 }
  0x9b   : > { %v924_v53 = vsel %vm920_vm5, %v913_v49, %v750_v44  ;;  %v949_v57 = vsel %vm947_vm8, %v940_v24, %v824_v43  ;;  %v1113_v43 = vld [vmem:[#allocation2 + $0x18] sm:$0x1]  ;;  %v1139_v44 = vld [vmem:[#allocation2 + $0x1c] sm:$0x1]  ;;  %v1111_v24 = vsel %vm3012_vm1, 0, %v1110_v52 }
  0x9c   : > { %v933_v55 = vsel %vm929_vm6, %v924_v53, %v778_v36  ;;  %v1107_v36 = vld [vmem:[#allocation2 + $0x8] sm:$0x1]  ;;  %v1140_v49 = vsel %vm3021_vm3, 0, %v1139_v44  ;;  %v1136_v53 = vld [vmem:[#allocation2 + $0x14] sm:$0x1] }
  0x9d   : > { %v942_v48 = vsel %vm938_vm7, %v933_v55, %v806_v39  ;;  %v2649_v39 = vmov 0   ;;  %v1108_v40 = vsel %vm3012_vm1, 0, %v1107_v36  ;;  %1141 = vst [vmem:[#allocation2 + $0x1c] sm:$0x1] %v1140_v49  ;;  %v1137_v55 = vsel %vm3021_vm3, 0, %v1136_v53 }
  0x9e   : > { %v852_v47 = vpop.permute.xlu0 %851  ;;  %v826_v50 = vpop.permute.xlu1 %825  ;;  %1097 = vst.msk [vmem:[#allocation2] sm:$0xf] %vm1096_vm0, %v2649_v39  ;;  %1101 = vst.msk [vmem:[#allocation2 + $0x48] sm:$0xf] %vm1096_vm0, %v2649_v39  ;;  %2581 = vset.pattern.permute.xlu0 %v2649_v39 }
  0x9f   : > { %v958_v42 = vsel %vm956_vm9, %v949_v57, %v852_v47  ;;  %v951_v60 = vsel %vm947_vm8, %v942_v48, %v826_v50  ;;  %1099 = vst.msk [vmem:[#allocation2 + $0x4] sm:$0x1] %vm1098_vm13, %v2649_v39  ;;  %1102 = vst.msk [vmem:[#allocation2 + $0x4c] sm:$0x1] %vm1098_vm13, %v2649_v39  ;;  %v1114_v47 = vsel %vm3012_vm1, 0, %v1113_v43  ;;  %vm2191_vm13 = vcmask 916480  }
  0xa0   : > { %1109 = vst [vmem:[#allocation2 + $0x8] sm:$0x1] %v1108_v40  ;;  %v1116_v50 = vld [vmem:[#allocation2 + $0x20] sm:$0x1]  ;;  %1115 = vst [vmem:[#allocation2 + $0x18] sm:$0x1] %v1114_v47 }
  0xa1   : > { %1112 = vst [vmem:[#allocation2 + $0x10] sm:$0x1] %v1111_v24  ;;  %1138 = vst [vmem:[#allocation2 + $0x14] sm:$0x1] %v1137_v55  ;;  %v1145_v48 = vld [vmem:[#allocation2 + $0x2c] sm:$0x1] }
  0xa2   : > { %v880_v19 = vpop.permute.xlu0 %879  ;;  %v854_v54 = vpop.permute.xlu1 %853  ;;  %v1346_v52 = vld [vmem:[#allocation2 + $0xc] sm:$0x1] }
  0xa3   : > { %v967_v23 = vsel %vm965_vm10, %v958_v42, %v880_v19  ;;  %v960_v26 = vsel %vm956_vm9, %v951_v60, %v854_v54  ;;  %v1117_v19 = vsel %vm3012_vm1, 0, %v1116_v50  ;;  %v1142_v54 = vld [vmem:[#allocation2 + $0x24] sm:$0x1]  ;;  %v1119_v42 = vld [vmem:[#allocation2 + $0x28] sm:$0x1] }
  0xa4   : > { %1118 = vst [vmem:[#allocation2 + $0x20] sm:$0x1] %v1117_v19  ;;  %v1143_v57 = vsel %vm3021_vm3, 0, %v1142_v54  ;;  %v1125_v60 = vld [vmem:[#allocation2 + $0x38] sm:$0x1] }
  0xa5   : > { %1144 = vst [vmem:[#allocation2 + $0x24] sm:$0x1] %v1143_v57  ;;  %v1770_v39 = vld [vmem:[#allocation2 + $0x48] sm:$0xf] }
  0xa6   : > { %v900_v31 = vpop.permute.xlu0 %899  ;;  %v882_v58 = vpop.permute.xlu1 %881  ;;  %v1878_v54 = vshrl.u32 %v1770_v39, 16 }
  0xa7   : > { %v976_v59 = vsel %vm974_vm11, %v967_v23, %v900_v31  ;;  %v969_v62 = vsel %vm965_vm10, %v960_v26, %v882_v58  ;;  %v1120_v23 = vsel %vm3012_vm1, 0, %v1119_v42  ;;  %v1146_v31 = vsel %vm3021_vm3, 0, %v1145_v48  ;;  %v1122_v58 = vld [vmem:[#allocation2 + $0x30] sm:$0x1]  ;;  %v1343_v50 = vld [vmem:[#allocation2 + $0x8] sm:$0xf] }
  0xa8   : > { %2549 = vmatprep.mubr.msk.bf16.mxu0 %vm1010_vm12, %v976_v59  ;;  %1121 = vst [vmem:[#allocation2 + $0x28] sm:$0x1] %v1120_v23  ;;  %1147 = vst [vmem:[#allocation2 + $0x2c] sm:$0x1] %v1146_v31  ;;  %v1148_v59 = vld [vmem:[#allocation2 + $0x34] sm:$0x1] }
  0xa9   : > { %v1123_v26 = vsel %vm3012_vm1, 0, %v1122_v58  ;;  %v1355_v53 = vld [vmem:[#allocation2 + $0x18] sm:$0xf]  ;;  %v1358_v23 = vld [vmem:[#allocation2 + $0x1c] sm:$0x1]  ;;  %v1881_v31 = vshll.u32 %v1770_v39, 16 }
  0xaa   : > { %v732_v61 = vpop.permute.xlu0 %731  ;;  %v902_v63 = vpop.permute.xlu1 %901  ;;  %1124 = vst [vmem:[#allocation2 + $0x30] sm:$0x1] %v1123_v26 }
  0xab   : > { %v978_v0 = vsel %vm974_vm11, %v969_v62, %v902_v63  ;;  %v916_v8 = vsel %vm907_vm4, %v2408_v14, %v732_v61  ;;  %v1149_v61 = vsel %vm3021_vm3, 0, %v1148_v59  ;;  %v1126_v62 = vsel %vm3012_vm1, 0, %v1125_v60  ;;  %v1151_v63 = vld [vmem:[#allocation2 + $0x3c] sm:$0x1]  ;;  %v1361_v60 = vld [vmem:[#allocation2 + $0x20] sm:$0xf] }
  0xac   : > { %2550 = vmatmul.mubr.msk.bf16.vlgmr.msra.gmra.mrb[0].mxu0 %vm1010_vm12, %v978_v0  ;;  %1150 = vst [vmem:[#allocation2 + $0x34] sm:$0x1] %v1149_v61  ;;  %1127 = vst [vmem:[#allocation2 + $0x38] sm:$0x1] %v1126_v62  ;;  %v1152_v0 = vsel %vm3021_vm3, 0, %v1151_v63 }
  0xad   : > { %1153 = vst [vmem:[#allocation2 + $0x3c] sm:$0x1] %v1152_v0 }
  0xae   : > { %v734_v1 = vpop.permute.xlu1 %733  ;;  %v752_v2 = vpop.permute.xlu0 %751 }
  0xaf   : > { %v926_v12 = vsel %vm920_vm5, %v916_v8, %v752_v2  ;;  %v919_v20 = vsel %vm907_vm4, %v2409_v15, %v734_v1  ;;  %vm3029_vm4 = vmand %vm1096_vm0, %vm1131_vm15  ;;  %v1128_v1 = vld [vmem:[#allocation2 + $0x40] sm:$0x1]  ;;  %v1154_v2 = vld [vmem:[#allocation2 + $0x44] sm:$0x1] }
  0xb2   : > { %v754_v3 = vpop.permute.xlu1 %753  ;;  %v780_v4 = vpop.permute.xlu0 %779 }
  0xb3   : > { %v935_v13 = vsel %vm929_vm6, %v926_v12, %v780_v4  ;;  %v928_v25 = vsel %vm920_vm5, %v919_v20, %v754_v3  ;;  %v1129_v3 = vsel %vm3012_vm1, 0, %v1128_v1  ;;  %v1155_v4 = vsel %vm3021_vm3, 0, %v1154_v2  ;;  %v1364_v2 = vld [vmem:[#allocation2 + $0x24] sm:$0x1] }
  0xb4   : > { %1130 = vst [vmem:[#allocation2 + $0x40] sm:$0x1] %v1129_v3  ;;  %1156 = vst [vmem:[#allocation2 + $0x44] sm:$0x1] %v1155_v4  ;;  %v1349_v3 = vld [vmem:[#allocation2 + $0x10] sm:$0xf] }
  0xb5   : > { %v1352_v4 = vld [vmem:[#allocation2 + $0x14] sm:$0x1] }
  0xb6   : > { %v782_v5 = vpop.permute.xlu1 %781  ;;  %v808_v6 = vpop.permute.xlu0 %807 }
  0xb7   : > { %v944_v18 = vsel %vm938_vm7, %v935_v13, %v808_v6  ;;  %v937_v29 = vsel %vm929_vm6, %v928_v25, %v782_v5  ;;  %v3064_v5 = vld [vmem:[%s3564_s4] ss:$0 sm:$0xff]  ;;  %vm1543_vm6 = vcmask 1042432  }
  0xb8   : > { %v1391_v25 = vld [vmem:[#allocation2] sm:$0xf] }
  0xba   : > { %v810_v7 = vpop.permute.xlu1 %809  ;;  %v828_v9 = vpop.permute.xlu0 %827 }
  0xbb   : > { %v953_v21 = vsel %vm947_vm8, %v944_v18, %v828_v9  ;;  %v946_v30 = vsel %vm938_vm7, %v937_v29, %v810_v7 }
  0xbe   : > { %v830_v10 = vpop.permute.xlu1 %829  ;;  %v856_v11 = vpop.permute.xlu0 %855 }
  0xbf   : > { %v962_v22 = vsel %vm956_vm9, %v953_v21, %v856_v11  ;;  %v955_v37 = vsel %vm947_vm8, %v946_v30, %v830_v10  ;;  %vm1544_vm8 = vcmask 1046532  }
  0xc2   : > { %v858_v16 = vpop.permute.xlu1 %857  ;;  %v884_v17 = vpop.permute.xlu0 %883 }
  0xc3   : > { %v971_v14 = vsel %vm965_vm10, %v962_v22, %v884_v17  ;;  %v964_v51 = vsel %vm956_vm9, %v955_v37, %v858_v16  ;;  %v1408_v37 = vshrl.u32 %v1391_v25, 16  ;;  %vm3096_vm9 = vmor %vm1543_vm6, %vm1544_vm8 }
  0xc5   : > { %v3074_v47 = vrot.slane %v1408_v37, 4  ;;  %v3102_v37 = vld [vmem:[#allocation2 + $0x4c] sm:$0x1] }
  0xc6   : > { %v886_v27 = vpop.permute.xlu1 %885  ;;  %v904_v28 = vpop.permute.xlu0 %903 }
  0xc7   : > { %v980_v32 = vsel %vm974_vm11, %v971_v14, %v904_v28  ;;  %v973_v15 = vsel %vm965_vm10, %v964_v51, %v886_v27  ;;  %v1411_v51 = vshll.u32 %v1391_v25, 16  ;;  %v1883_v25 = vrot.slane %v1881_v31, 5 }
  0xc8   : > { %2553 = vmatprep.mubr.msk.bf16.mxu0 %vm1010_vm12, %v980_v32  ;;  %vm2173_vm10 = vcmask 654336  }
  0xc9   : > { %v3076_v49 = vrot.slane %v1411_v51, 5 }
  0xca   : > { %v906_v33 = vpop.permute.xlu1 %905  ;;  %v1198_v6 = vpop.permute.xlu0 %1197 }
  0xcb   : > { %v982_v34 = vsel %vm974_vm11, %v973_v15, %v906_v33 }
  0xcc   : > { %2554 = vmatmul.mubr.msk.bf16.gmra.mrb[4].mxu0 %vm1010_vm12, %v982_v34  ;;  %vm2182_vm12 = vcmask 785408  }
  0xce   : > { %v1200_v9 = vpop.permute.xlu1 %1199  ;;  %v1202_v21 = vpop.permute.xlu0 %1201 }
  0xd2   : > { %v1204_v28 = vpop.permute.xlu1 %1203 }
 0x17f   : > { %v2551_v7 = vpop.f32.mrb[0].mxu0 }
 0x180   : > { %v1066_v10 = vadd.f32 %v2551_v7, %v3064_v5  ;;  %v1057_v11 = vpop.f32.mrb[1].mxu0 }
 0x181   : > { %v1058_v8 = vadd.f32 %v3064_v5, %v1057_v11  ;;  %v2552_v12 = vpop.f32.mrb[2].mxu0 }
 0x182   : > { %v1090_v13 = vmax.f32 %v1066_v10, 0.0  ;;  %v1069_v16 = vadd.f32 %v2552_v12, %v3064_v5  ;;  %v1060_v17 = vpop.f32.mrb[3].mxu0 }
 0x183   : > { %v1088_v18 = vmax.f32 %v1058_v8, 0.0  ;;  %v1061_v20 = vadd.f32 %v3064_v5, %v1060_v17  ;;  %v1519_v17 = vld [vmem:[#allocation2] sm:$0xe] }
 0x184   : > { %v1159_v22 = vpack.c.bf16 %v1090_v13, %v1090_v13  ;;  %v1091_v29 = vmax.f32 %v1069_v16, 0.0  ;;  %v1399_v16 = vld [vmem:[#allocation2 + $0x4] sm:$0x1] }
 0x185   : > { %v1157_v14 = vpack.c.bf16 %v1088_v18, %v1088_v18  ;;  %v1089_v27 = vmax.f32 %v1061_v20, 0.0 }
 0x186   : > { %v1160_v30 = vpack.c.bf16 %v1091_v29, %v1091_v29  ;;  %v1221_v32 = vsel %vm920_vm5, %v1159_v22, %v1202_v21  ;;  %v1880_v21 = vrot.slane %v1878_v54, 4 }
 0x187   : > { %v1215_v15 = vsel %vm920_vm5, %v1157_v14, %v1198_v6  ;;  %v1158_v33 = vpack.c.bf16 %v1089_v27, %v1089_v27  ;;  %v2460_v34 = vcombine.low %v1221_v32, %v1221_v32  ;;  %v1417_v14 = vshll.u32 %v1399_v16, 16 }
 0x188   : > { %v2458_v36 = vcombine.low %v1215_v15, %v1215_v15  ;;  %v1224_v38 = vsel %vm920_vm5, %v1160_v30, %v1204_v28  ;;  %v2466_v27 = vrot.slane %v1519_v17, 9  ;;  %v1548_v28 = vrot.slane %v1399_v16, 5 }
 0x189   : > { %v1218_v40 = vsel %vm920_vm5, %v1158_v33, %v1200_v9  ;;  %v1278_v41 = vshrl.u32 %v2460_v34, 16  ;;  %v2461_v43 = vcombine.low %v1224_v38, %v1224_v38  ;;  %v1281_v24 = vshll.u32 %v2460_v34, 16 }
 0x18a   : > { %v1262_v44 = vshrl.u32 %v2458_v36, 16  ;;  %v2459_v45 = vcombine.low %v1218_v40, %v1218_v40  ;;  %v1265_v42 = vshll.u32 %v2458_v36, 16  ;;  %v1414_v32 = vor.u32 %v3076_v49, %v3074_v47 }
 0x18b   : > { %v1280_v19 = vrot.slane %v1278_v41, 7  ;;  %v1286_v55 = vshrl.u32 %v2461_v43, 16  ;;  %v1289_v61 = vshll.u32 %v2461_v43, 16  ;;  %v1884_v51 = vor.u32 %v1883_v25, %v1880_v21 }
 0x18c   : > { %v1264_v57 = vrot.slane %v1262_v44, 7  ;;  %v1270_v48 = vshrl.u32 %v2459_v45, 16  ;;  %v1273_v1 = vshll.u32 %v2459_v45, 16  ;;  %v1887_v15 = vshll.u32 %v3102_v37, 16 }
 0x18d   : > { %v1283_v58 = vor.u32 %v1281_v24, %v1280_v19  ;;  %v1284_v59 = vrot.slane %v1280_v19, 4  ;;  %v1288_v26 = vrot.slane %v1286_v55, 7  ;;  %v3105_v33 = vrot.slane %v1417_v14, 5 }
 0x18e   : > { %v1267_v62 = vor.u32 %v1265_v42, %v1264_v57  ;;  %v1268_v63 = vrot.slane %v1264_v57, 4  ;;  %v1272_v0 = vrot.slane %v1270_v48, 7  ;;  %v3111_v39 = vsel %vm3096_vm9, %v2466_v27, %v1548_v28 }
 0x18f   : > { %v1356_v6 = vsel %vm3029_vm4, %v1283_v58, %v1355_v53  ;;  %v1359_v7 = vsel %vm3012_vm1, %v1284_v59, %v1358_v23  ;;  %v1291_v9 = vor.u32 %v1289_v61, %v1288_v26  ;;  %v1292_v10 = vrot.slane %v1288_v26, 4 }
 0x190   : > { %v1344_v11 = vsel %vm3029_vm4, %v1267_v62, %v1343_v50  ;;  %v1347_v8 = vsel %vm3012_vm1, %v1268_v63, %v1346_v52  ;;  %v1275_v12 = vor.u32 %v1273_v1, %v1272_v0  ;;  %v1276_v13 = vrot.slane %v1272_v0, 4  ;;  %1357 = vst [vmem:[#allocation2 + $0x18] sm:$0xf] %v1356_v6  ;;  %1360 = vst [vmem:[#allocation2 + $0x1c] sm:$0x1] %v1359_v7 }
 0x191   : > { %1345 = vst [vmem:[#allocation2 + $0x8] sm:$0xf] %v1344_v11  ;;  %1348 = vst [vmem:[#allocation2 + $0xc] sm:$0x1] %v1347_v8  ;;  %v1362_v18 = vsel %vm3029_vm4, %v1291_v9, %v1361_v60  ;;  %v1365_v20 = vsel %vm3012_vm1, %v1292_v10, %v1364_v2  ;;  %v3113_v44 = vrot.slane %v1414_v32, 4  ;;  %v3116_v52 = vrot.slane %v1884_v51, 4 }
 0x192   : > { %v1350_v22 = vsel %vm3029_vm4, %v1275_v12, %v1349_v3  ;;  %v1353_v29 = vsel %vm3012_vm1, %v1276_v13, %v1352_v4  ;;  %1363 = vst [vmem:[#allocation2 + $0x20] sm:$0xf] %v1362_v18  ;;  %1366 = vst [vmem:[#allocation2 + $0x24] sm:$0x1] %v1365_v20  ;;  %v3118_v53 = vrot.slane %v1887_v15, 5  ;;  %v1206_v4 = vpop.permute.xlu0 %1205 }
 0x193   : > { %1351 = vst [vmem:[#allocation2 + $0x10] sm:$0xf] %v1350_v22  ;;  %1354 = vst [vmem:[#allocation2 + $0x14] sm:$0x1] %v1353_v29 }
 0x197   : > { %v1580_v34 = vld [vmem:[#allocation2 + $0x18] sm:$0xf]  ;;  %v3107_v36 = vld [vmem:[#allocation2 + $0x1c] sm:$0x1] }
 0x198   : > { %v1892_v38 = vld [vmem:[#allocation2 + $0x18] sm:$0xe]  ;;  %v1623_v40 = vshrl.u32 %v1580_v34, 16  ;;  %v1626_v41 = vshll.u32 %v1580_v34, 16  ;;  %v1578_v43 = vld [vmem:[#allocation2 + $0x8] sm:$0xf] }
 0x199   : > { %v1581_v47 = vld [vmem:[#allocation2 + $0x20] sm:$0xf]  ;;  %v1595_v49 = vshrl.u32 %v1578_v43, 16  ;;  %v1598_v50 = vshll.u32 %v1578_v43, 16  ;;  %v2483_v54 = vrot.slane %v1892_v38, 9  ;;  %v1921_v57 = vrot.slane %v3107_v36, 5 }
 0x19a   : > { %v2503_v19 = vcombine.low %v1580_v34, %v1581_v47  ;;  %v1637_v24 = vshrl.u32 %v1581_v47, 16  ;;  %v1579_v55 = vld [vmem:[#allocation2 + $0x10] sm:$0xf]  ;;  %v3121_v42 = vrot.slane %v1623_v40, 4  ;;  %v1640_v48 = vshll.u32 %v1581_v47, 16 }
 0x19b   : > { %v2502_v23 = vcombine.low %v1578_v43, %v1579_v55  ;;  %v3123_v31 = vld [vmem:[#allocation2 + $0x14] sm:$0x1]  ;;  %v3126_v59 = vrot.slane %v1626_v41, 5  ;;  %v3129_v60 = vrot.slane %v1595_v49, 4  ;;  %v1609_v26 = vshrl.u32 %v1579_v55, 16 }
 0x19c   : > { %2029 = vrot.lane.b32.xlu1 %v2503_v19, %s2650_s25  ;;  %v1612_v61 = vshll.u32 %v1579_v55, 16  ;;  %v1891_v62 = vld [vmem:[#allocation2 + $0x10] sm:$0xe]  ;;  %v3131_v63 = vrot.slane %v1637_v24, 4  ;;  %v3133_v0 = vrot.slane %v1598_v50, 5  ;;  %v1917_v2 = vrot.slane %v3123_v31, 5  ;;  %v1208_v50 = vpop.permute.xlu1 %1207 }
 0x19d   : > { %2027 = vrot.lane.b32.xlu0 %v2502_v23, %s2650_s25  ;;  %v2482_v1 = vrot.slane %v1891_v62, 9  ;;  %v3137_v3 = vld [vmem:[#allocation2 + $0x10] sm:$0xf]  ;;  %v3139_v6 = vrot.slane %v1640_v48, 5  ;;  %v1922_v9 = vsel %vm3096_vm9, %v2483_v54, %v1921_v57  ;;  %v3144_v10 = vld [vmem:[#allocation2 + $0x18] sm:$0xf]  ;;  %v1210_v48 = vpop.permute.xlu0 %1209 }
 0x19e   : > { %v1780_v11 = vshrl.u32 %v3137_v3, 16  ;;  %v3147_v8 = vrot.slane %v1609_v26, 4  ;;  %v3149_v12 = vrot.slane %v1612_v61, 5  ;;  %v2514_v17 = vcombine.low %v3137_v3, %v3144_v10  ;;  %v3155_v18 = vld [vmem:[#allocation2 + $0xc] sm:$0x1] }
 0x19f   : > { %v2555_v13 = vpop.f32.mrb[4].mxu0  ;;  %v1918_v16 = vsel %vm3096_vm9, %v2482_v1, %v1917_v2  ;;  %v1783_v22 = vshll.u32 %v3137_v3, 16  ;;  %v1794_v29 = vshrl.u32 %v3144_v10, 16  ;;  %v3160_v14 = vld [vmem:[#allocation2 + $0x14] sm:$0x1]  ;;  %v1797_v32 = vshll.u32 %v3144_v10, 16 }
 0x1a0   : > { %v1082_v20 = vadd.f32 %v2555_v13, %v3064_v5  ;;  %v1073_v21 = vpop.f32.mrb[5].mxu0  ;;  %v2522_v25 = vcombine.low %v1918_v16, %v1922_v9  ;;  %v3163_v28 = vrot.slane %v1780_v11, 4  ;;  %2095 = vrot.lane.b32.xlu1 %v2514_v17, %s2651_s26  ;;  %v1706_v15 = vld [vmem:[#allocation2 + $0x8] sm:$0xe]  ;;  %v1732_v34 = vrot.slane %v3155_v18, 5 }
 0x1a1   : > { %v1074_v27 = vadd.f32 %v3064_v5, %v1073_v21  ;;  %v2556_v51 = vpop.f32.mrb[6].mxu0  ;;  %v1707_v41 = vld [vmem:[#allocation2 + $0x10] sm:$0xe]  ;;  %v2474_v43 = vrot.slane %v1706_v15, 9  ;;  %v1736_v47 = vrot.slane %v3160_v14, 5  ;;  %v3246_v3 = vrot.slane %v1797_v32, 5 }
 0x1a2   : > { %v1094_v38 = vmax.f32 %v1082_v20, 0.0  ;;  %2528 = vmatprep.subr.msk.bf16.mxu1 %vm938_vm7, %v2522_v25  ;;  %v1085_v40 = vadd.f32 %v2556_v51, %v3064_v5  ;;  %v1076_v49 = vpop.f32.mrb[7].mxu0  ;;  %v2475_v24 = vrot.slane %v1707_v41, 9  ;;  %v3172_v54 = vld [vmem:[#allocation2 + $0xc] sm:$0x1]  ;;  %v1615_v46 = vor.u32 %v3149_v12, %v3147_v8 }
 0x1a3   : > { %v1092_v19 = vmax.f32 %v1074_v27, 0.0  ;;  %v1077_v55 = vadd.f32 %v3064_v5, %v1076_v49  ;;  %v1520_v57 = vld [vmem:[#allocation2 + $0x8] sm:$0xe]  ;;  %v1733_v62 = vsel %vm3096_vm9, %v2474_v43, %v1732_v34  ;;  %v3180_v2 = vld [vmem:[#allocation2 + $0x14] sm:$0x1]  ;;  %v1552_v13 = vrot.slane %v3172_v54, 5 }
 0x1a4   : > { %v1163_v26 = vpack.c.bf16 %v1094_v38, %v1094_v38  ;;  %v1095_v61 = vmax.f32 %v1085_v40, 0.0  ;;  %v2467_v1 = vrot.slane %v1520_v57, 9  ;;  %v1737_v5 = vsel %vm3096_vm9, %v2475_v24, %v1736_v47  ;;  %v1521_v16 = vld [vmem:[#allocation2 + $0x10] sm:$0xe]  ;;  %v1522_v17 = vld [vmem:[#allocation2 + $0x18] sm:$0xe] }
 0x1a5   : > { %v1161_v9 = vpack.c.bf16 %v1092_v19, %v1092_v19  ;;  %v1093_v11 = vmax.f32 %v1077_v55, 0.0  ;;  %v2510_v21 = vcombine.low %v1733_v62, %v1737_v5  ;;  %v3186_v27 = vld [vmem:[#allocation2 + $0x1c] sm:$0x1]  ;;  %v2468_v51 = vrot.slane %v1521_v16, 9  ;;  %v1212_v19 = vpop.permute.xlu1 %1211  ;;  %v1708_v57 = vld [vmem:[#allocation2 + $0x18] sm:$0xe] }
 0x1a6   : > { %v1164_v20 = vpack.c.bf16 %v1095_v61, %v1095_v61  ;;  %v1233_v25 = vsel %vm920_vm5, %v1163_v26, %v1210_v48  ;;  %v1553_v38 = vsel %vm3096_vm9, %v2467_v1, %v1552_v13  ;;  %v1556_v47 = vrot.slane %v3180_v2, 5  ;;  %v3201_v1 = vld [vmem:[#allocation2 + $0x1c] sm:$0x1]  ;;  %v1370_v5 = vld [vmem:[#allocation2 + $0x2c] sm:$0x1] }
 0x1a7   : > { %v1227_v15 = vsel %vm920_vm5, %v1161_v9, %v1206_v4  ;;  %v1162_v34 = vpack.c.bf16 %v1093_v11, %v1093_v11  ;;  %v2464_v40 = vcombine.low %v1233_v25, %v1233_v25  ;;  %2067 = vrot.lane.b32.xlu0 %v2510_v21, %s2652_s27  ;;  %v2498_v43 = vcombine.low %v3111_v39, %v1553_v38  ;;  %v1367_v9 = vld [vmem:[#allocation2 + $0x28] sm:$0xf]  ;;  %v1379_v11 = vld [vmem:[#allocation2 + $0x38] sm:$0xf]  ;;  %v1382_v13 = vld [vmem:[#allocation2 + $0x3c] sm:$0x1] }
 0x1a8   : > { %v2462_v41 = vcombine.low %v1227_v15, %v1227_v15  ;;  %v2469_v49 = vrot.slane %v1522_v17, 9  ;;  %v1560_v4 = vrot.slane %v3186_v27, 5  ;;  %v1601_v48 = vor.u32 %v3133_v0, %v3129_v60  ;;  %v1709_v38 = vld [vmem:[#allocation2 + $0x20] sm:$0xe] }
 0x1a9   : > { %v1230_v24 = vsel %vm920_vm5, %v1162_v34, %v1208_v50  ;;  %v1310_v55 = vshrl.u32 %v2464_v40, 16  ;;  %1999 = vrot.lane.b32.xlu1 %v2498_v43, %s2648_s14  ;;  %v1313_v62 = vshll.u32 %v2464_v40, 16  ;;  %v1557_v39 = vsel %vm3096_vm9, %v2468_v51, %v1556_v47  ;;  %v1373_v43 = vld [vmem:[#allocation2 + $0x30] sm:$0xf]  ;;  %v1376_v51 = vld [vmem:[#allocation2 + $0x34] sm:$0x1] }
 0x1aa   : > { %v1294_v26 = vshrl.u32 %v2462_v41, 16  ;;  %v2463_v61 = vcombine.low %v1230_v24, %v1230_v24  ;;  %v1297_v50 = vshll.u32 %v2462_v41, 16  ;;  %v1561_v17 = vsel %vm3096_vm9, %v2469_v49, %v1560_v4  ;;  %v3208_v49 = vld [vmem:[#allocation2 + $0x24] sm:$0x1] }
 0x1ab   : > { %v1312_v16 = vrot.slane %v1310_v55, 7  ;;  %v1236_v21 = vsel %vm920_vm5, %v1164_v20, %v1212_v19  ;;  %v2499_v34 = vcombine.low %v1557_v39, %v1561_v17  ;;  %v2476_v40 = vrot.slane %v1708_v57, 9 }
 0x1ac   : > { %v1296_v25 = vrot.slane %v1294_v26, 7  ;;  %v1302_v15 = vshrl.u32 %v2463_v61, 16  ;;  %v2465_v45 = vcombine.low %v1236_v21, %v1236_v21  ;;  %v1740_v41 = vrot.slane %v3201_v1, 5  ;;  %v1765_v26 = vld [vmem:[#allocation2 + $0x20] sm:$0xf] }
 0x1ad   : > { %v1315_v47 = vor.u32 %v1313_v62, %v1312_v16  ;;  %v1316_v24 = vrot.slane %v1312_v16, 4  ;;  %v1305_v23 = vshll.u32 %v2463_v61, 16  ;;  %2001 = vrot.lane.b32.xlu0 %v2499_v34, %s2648_s14  ;;  %v2477_v57 = vrot.slane %v1709_v38, 9  ;;  %v3214_v62 = vld [vmem:[#allocation2 + $0x8] sm:$0xf] }
 0x1ae   : > { %v1299_v58 = vor.u32 %v1297_v50, %v1296_v25  ;;  %v1300_v7 = vrot.slane %v1296_v25, 4  ;;  %v1304_v55 = vrot.slane %v1302_v15, 7  ;;  %v1318_v4 = vshrl.u32 %v2465_v45, 16 }
 0x1af   : > { %v1380_v20 = vsel %vm3029_vm4, %v1315_v47, %v1379_v11  ;;  %v1383_v19 = vsel %vm3012_vm1, %v1316_v24, %v1382_v13  ;;  %v1321_v17 = vshll.u32 %v2465_v45, 16  ;;  %v1741_v13 = vsel %vm3096_vm9, %v2476_v40, %v1740_v41 }
 0x1b0   : > { %v1368_v39 = vsel %vm3029_vm4, %v1299_v58, %v1367_v9  ;;  %v1371_v61 = vsel %vm3012_vm1, %v1300_v7, %v1370_v5  ;;  %v1307_v50 = vor.u32 %v1305_v23, %v1304_v55  ;;  %v1308_v16 = vrot.slane %v1304_v55, 4  ;;  %1381 = vst [vmem:[#allocation2 + $0x38] sm:$0xf] %v1380_v20  ;;  %1384 = vst [vmem:[#allocation2 + $0x3c] sm:$0x1] %v1383_v19 }
 0x1b1   : > { %1369 = vst [vmem:[#allocation2 + $0x28] sm:$0xf] %v1368_v39  ;;  %1372 = vst [vmem:[#allocation2 + $0x2c] sm:$0x1] %v1371_v61  ;;  %v1320_v11 = vrot.slane %v1318_v4, 7  ;;  %v1744_v21 = vrot.slane %v3208_v49, 5  ;;  %v1629_v8 = vor.u32 %v3126_v59, %v3121_v42  ;;  %v1643_v60 = vor.u32 %v3139_v6, %v3131_v63 }
 0x1b2   : > { %v1374_v25 = vsel %vm3029_vm4, %v1307_v50, %v1373_v43  ;;  %v1377_v58 = vsel %vm3012_vm1, %v1308_v16, %v1376_v51  ;;  %v1385_v7 = vld [vmem:[#allocation2 + $0x40] sm:$0xf]  ;;  %v1388_v23 = vld [vmem:[#allocation2 + $0x44] sm:$0x1]  ;;  %v1808_v9 = vshrl.u32 %v1765_v26, 16  ;;  %v1422_v5 = vshrl.u32 %v3214_v62, 16 }
 0x1b3   : > { %1375 = vst [vmem:[#allocation2 + $0x30] sm:$0xf] %v1374_v25  ;;  %1378 = vst [vmem:[#allocation2 + $0x34] sm:$0x1] %v1377_v58  ;;  %v1323_v15 = vor.u32 %v1321_v17, %v1320_v11  ;;  %v1324_v45 = vrot.slane %v1320_v11, 4  ;;  %v1745_v34 = vsel %vm3096_vm9, %v2477_v57, %v1744_v21  ;;  %v1811_v38 = vshll.u32 %v1765_v26, 16 }
 0x1b4   : > { %v3232_v40 = vrot.slane %v1783_v22, 5  ;;  %v2511_v43 = vcombine.low %v1741_v13, %v1745_v34  ;;  %v1424_v47 = vrot.slane %v1422_v5, 4  ;;  %v1425_v51 = vshll.u32 %v3214_v62, 16  ;;  %v3270_v25 = vld [vmem:[#allocation2 + $0x10] sm:$0xf] }
 0x1b5   : > { %v3237_v24 = vrot.slane %v1794_v29, 4  ;;  %v1386_v41 = vsel %vm3029_vm4, %v1323_v15, %v1385_v7  ;;  %v1389_v55 = vsel %vm3012_vm1, %v1324_v45, %v1388_v23  ;;  %v1431_v20 = vshll.u32 %v3172_v54, 16  ;;  %v3284_v5 = vld [vmem:[#allocation2 + $0x18] sm:$0xf] }
 0x1b6   : > { %1387 = vst [vmem:[#allocation2 + $0x40] sm:$0xf] %v1386_v41  ;;  %1390 = vst [vmem:[#allocation2 + $0x44] sm:$0x1] %v1389_v55  ;;  %2069 = vrot.lane.b32.xlu1 %v2511_v43, %s2652_s27  ;;  %v1427_v22 = vrot.slane %v1425_v51, 5  ;;  %v1604_v29 = vshll.u32 %v3155_v18, 16  ;;  %v3577_v7 = vsel %vm2749_vm2, %v3113_v44, %v3105_v33 }
 0x1b7   : > { %v3252_v19 = vrot.slane %v1808_v9, 4  ;;  %v3254_v35 = vrot.slane %v1811_v38, 5  ;;  %v1768_v4 = vld [vmem:[#allocation2 + $0x38] sm:$0xf]  ;;  %v1602_v10 = vrot.slane %v1601_v48, 4  ;;  %v1618_v32 = vshll.u32 %v3160_v14, 16 }
 0x1b8   : > { %v1766_v54 = vld [vmem:[#allocation2 + $0x28] sm:$0xf]  ;;  %v1850_v57 = vshrl.u32 %v1768_v4, 16  ;;  %v1853_v39 = vshll.u32 %v1768_v4, 16  ;;  %v1428_v61 = vor.u32 %v1427_v22, %v1424_v47  ;;  %v1433_v50 = vrot.slane %v1431_v20, 5 }
 0x1b9   : > { %v1822_v18 = vshrl.u32 %v1766_v54, 16  ;;  %v2515_v16 = vcombine.low %v1765_v26, %v1766_v54  ;;  %v1632_v12 = vshll.u32 %v3201_v1, 16  ;;  %v1606_v13 = vrot.slane %v1604_v29, 5  ;;  %v1582_v43 = vld [vmem:[#allocation2 + $0x28] sm:$0xf] }
 0x1ba   : > { %v1767_v11 = vld [vmem:[#allocation2 + $0x30] sm:$0xf]  ;;  %v1429_v17 = vrot.slane %v1428_v61, 4  ;;  %v1616_v21 = vrot.slane %v1615_v46, 4  ;;  %v1825_v0 = vshll.u32 %v1766_v54, 16  ;;  %v3266_v14 = vrot.slane %v1850_v57, 4 }
 0x1bb   : > { %2097 = vrot.lane.b32.xlu0 %v2515_v16, %s2651_s26  ;;  %v3268_v48 = vrot.slane %v1853_v39, 5  ;;  %v2516_v26 = vcombine.low %v1767_v11, %v1768_v4  ;;  %v3272_v42 = vrot.slane %v1822_v18, 4  ;;  %v1607_v1 = vsel %vm2749_vm2, %v1602_v10, %v1606_v13  ;;  %v3299_v10 = vld [vmem:[#allocation2 + $0x24] sm:$0x1]  ;;  %v1523_v39 = vld [vmem:[#allocation2 + $0x20] sm:$0xe] }
 0x1bc   : > { %v1434_v59 = vsel %vm2749_vm2, %v1429_v17, %v1433_v50  ;;  %v1620_v58 = vrot.slane %v1618_v32, 5  ;;  %v1836_v63 = vshrl.u32 %v1767_v11, 16  ;;  %v1839_v6 = vshll.u32 %v1767_v11, 16 }
 0x1bd   : > { %2099 = vrot.lane.b32.xlu1 %v2516_v26, %s2651_s26  ;;  %v2494_v23 = vcombine.low %v3577_v7, %v1434_v59  ;;  %v1630_v9 = vrot.slane %v1629_v8, 4  ;;  %v1644_v45 = vrot.slane %v1643_v60, 4  ;;  %v1646_v34 = vshll.u32 %v3208_v49, 16  ;;  %v3305_v8 = vld [vmem:[#allocation2 + $0x2c] sm:$0x1] }
 0x1be   : > { %v1621_v15 = vsel %vm2749_vm2, %v1616_v21, %v1620_v58  ;;  %v1436_v38 = vshrl.u32 %v3270_v25, 16  ;;  %v1634_v51 = vrot.slane %v1632_v12, 5  ;;  %v1439_v41 = vshll.u32 %v3270_v25, 16  ;;  %v1524_v12 = vld [vmem:[#allocation2 + $0x28] sm:$0xe] }
 0x1bf   : > { %1979 = vrot.lane.b32.xlu0 %v2494_v23, %s2643_s29  ;;  %v2506_v47 = vcombine.low %v1607_v1, %v1621_v15  ;;  %v1445_v33 = vshll.u32 %v3180_v2, 16  ;;  %v1648_v44 = vrot.slane %v1646_v34, 5  ;;  %v1450_v20 = vshrl.u32 %v3284_v5, 16  ;;  %v1583_v21 = vld [vmem:[#allocation2 + $0x30] sm:$0xf] }
 0x1c0   : > { %v1438_v55 = vrot.slane %v1436_v38, 4  ;;  %v1453_v22 = vshll.u32 %v3284_v5, 16  ;;  %v1635_v49 = vsel %vm2749_vm2, %v1630_v9, %v1634_v51  ;;  %v1441_v29 = vrot.slane %v1439_v41, 5  ;;  %v3330_v41 = vld [vmem:[#allocation2 + $0x2c] sm:$0x1] }
 0x1c1   : > { %2047 = vrot.lane.b32.xlu1 %v2506_v47, %s2653_s28  ;;  %v1459_v46 = vshll.u32 %v3186_v27, 16  ;;  %v1651_v4 = vshrl.u32 %v1582_v43, 16  ;;  %v1649_v2 = vsel %vm2749_vm2, %v1644_v45, %v1648_v44  ;;  %v1452_v32 = vrot.slane %v1450_v20, 4  ;;  %v3320_v45 = vld [vmem:[#allocation2 + $0x24] sm:$0x1] }
 0x1c2   : > { %v1455_v54 = vrot.slane %v1453_v22, 5  ;;  %v1654_v57 = vshll.u32 %v1582_v43, 16  ;;  %v1827_v61 = vrot.slane %v1825_v0, 5  ;;  %v3303_v50 = vrot.slane %v1836_v63, 4  ;;  %v3337_v20 = vld [vmem:[#allocation2 + $0x38] sm:$0xf] }
 0x1c3   : > { %v2507_v18 = vcombine.low %v1635_v49, %v1649_v2  ;;  %v1442_v16 = vor.u32 %v1441_v29, %v1438_v55  ;;  %v3307_v11 = vrot.slane %v1839_v6, 5  ;;  %v1447_v27 = vrot.slane %v1445_v33, 5  ;;  %v3343_v29 = vld [vmem:[#allocation2 + $0x2c] sm:$0x1] }
 0x1c4   : > { %v1456_v17 = vor.u32 %v1455_v54, %v1452_v32  ;;  %v1461_v13 = vrot.slane %v1459_v46, 5  ;;  %v3310_v26 = vrot.slane %v1651_v4, 4  ;;  %v2470_v59 = vrot.slane %v1523_v39, 9  ;;  %v1710_v46 = vld [vmem:[#allocation2 + $0x28] sm:$0xe] }
 0x1c5   : > { %2049 = vrot.lane.b32.xlu0 %v2507_v18, %s2653_s28  ;;  %v1443_v60 = vrot.slane %v1442_v16, 4  ;;  %v1564_v0 = vrot.slane %v3299_v10, 5  ;;  %v3313_v58 = vrot.slane %v1654_v57, 5  ;;  %v2471_v63 = vrot.slane %v1524_v12, 9  ;;  %v3349_v32 = vld [vmem:[#allocation2 + $0x34] sm:$0x1] }
 0x1c6   : > { %v1457_v1 = vrot.slane %v1456_v17, 4  ;;  %v1568_v7 = vrot.slane %v3305_v8, 5  ;;  %v2504_v23 = vcombine.low %v1582_v43, %v1583_v21  ;;  %v1665_v9 = vshrl.u32 %v1583_v21, 16  ;;  %v1711_v54 = vld [vmem:[#allocation2 + $0x30] sm:$0xe] }
 0x1c7   : > { %v1448_v6 = vsel %vm2749_vm2, %v1443_v60, %v1447_v27  ;;  %v1786_v15 = vor.u32 %v3232_v40, %v3163_v28  ;;  %v1565_v38 = vsel %vm3096_vm9, %v2470_v59, %v1564_v0  ;;  %v1800_v51 = vor.u32 %v3246_v3, %v3237_v24  ;;  %v1585_v12 = vld [vmem:[#allocation2 + $0x40] sm:$0xf] }
 0x1c8   : > { %v1462_v34 = vsel %vm2749_vm2, %v1457_v1, %v1461_v13  ;;  %v1569_v47 = vsel %vm3096_vm9, %v2471_v63, %v1568_v7  ;;  %v3578_v40 = vshll.u32 %v3123_v31, 16  ;;  %v3579_v44 = vshll.u32 %v3107_v36, 16  ;;  %v3356_v60 = vld [vmem:[#allocation2 + $0x20] sm:$0xf]  ;;  %v3365_v7 = vld [vmem:[#allocation2 + $0x28] sm:$0xf] }
 0x1c9   : > { %v2495_v43 = vcombine.low %v1448_v6, %v1462_v34  ;;  %2031 = vrot.lane.b32.xlu0 %v2504_v23, %s2650_s25  ;;  %v1787_v28 = vrot.slane %v1786_v15, 4  ;;  %v1801_v22 = vrot.slane %v1800_v51, 4  ;;  %v1814_v49 = vor.u32 %v3254_v35, %v3252_v19 }
 0x1ca   : > { %v1791_v33 = vrot.slane %v3578_v40, 5  ;;  %v1805_v55 = vrot.slane %v3579_v44, 5  ;;  %v1817_v24 = vshll.u32 %v3320_v45, 16  ;;  %v1828_v3 = vor.u32 %v1827_v61, %v3272_v42  ;;  %v3379_v44 = vld [vmem:[#allocation2 + $0x34] sm:$0x1] }
 0x1cb   : > { %1981 = vrot.lane.b32.xlu1 %v2495_v43, %s2643_s29  ;;  %v1668_v31 = vshll.u32 %v1583_v21, 16  ;;  %v2500_v4 = vcombine.low %v1565_v38, %v1569_v47  ;;  %v1831_v2 = vshll.u32 %v3330_v41, 16  ;;  %v1815_v35 = vrot.slane %v1814_v49, 4 }
 0x1cc   : > { %v1792_v36 = vsel %vm2749_vm2, %v1787_v28, %v1791_v33  ;;  %v1806_v19 = vsel %vm2749_vm2, %v1801_v22, %v1805_v55  ;;  %v1819_v42 = vrot.slane %v1817_v24, 5  ;;  %v1829_v57 = vrot.slane %v1828_v3, 4  ;;  %v1525_v24 = vld [vmem:[#allocation2 + $0x30] sm:$0xe] }
 0x1cd   : > { %v2518_v39 = vcombine.low %v1792_v36, %v1806_v19  ;;  %v1833_v61 = vrot.slane %v1831_v2, 5  ;;  %v2478_v18 = vrot.slane %v1710_v46, 9  ;;  %v1748_v16 = vrot.slane %v3343_v29, 5  ;;  %v3390_v36 = vld [vmem:[#allocation2 + $0x3c] sm:$0x1] }
 0x1ce   : > { %v1667_v27 = vrot.slane %v1665_v9, 4  ;;  %v2479_v17 = vrot.slane %v1711_v54, 9  ;;  %v1752_v13 = vrot.slane %v3349_v32, 5  ;;  %v1679_v21 = vshrl.u32 %v3337_v20, 16 }
 0x1cf   : > { %v1670_v59 = vrot.slane %v1668_v31, 5  ;;  %2003 = vrot.lane.b32.xlu1 %v2500_v4, %s2648_s14  ;;  %2115 = vrot.lane.b32.xlu0 %v2518_v39, %s2654_s30  ;;  %v1820_v0 = vsel %vm2749_vm2, %v1815_v35, %v1819_v42  ;;  %v1834_v1 = vsel %vm2749_vm2, %v1829_v57, %v1833_v61  ;;  %v1682_v63 = vshll.u32 %v3337_v20, 16  ;;  %v1526_v42 = vld [vmem:[#allocation2 + $0x38] sm:$0xe] }
 0x1d0   : > { %v1749_v6 = vsel %vm3096_vm9, %v2478_v18, %v1748_v16  ;;  %v1753_v23 = vsel %vm3096_vm9, %v2479_v17, %v1752_v13  ;;  %v2505_v9 = vcombine.low %v3337_v20, %v1585_v12  ;;  %v1693_v15 = vshrl.u32 %v1585_v12, 16  ;;  %v3396_v18 = vld [vmem:[#allocation2 + $0x30] sm:$0xf] }
 0x1d1   : > { %v2519_v34 = vcombine.low %v1820_v0, %v1834_v1  ;;  %v2512_v38 = vcombine.low %v1749_v6, %v1753_v23  ;;  %v1696_v47 = vshll.u32 %v1585_v12, 16  ;;  %v1464_v51 = vshrl.u32 %v3356_v60, 16  ;;  %v3401_v0 = vld [vmem:[#allocation2 + $0x38] sm:$0xf] }
 0x1d2   : > { %v3373_v43 = vrot.slane %v1679_v21, 4  ;;  %v3375_v28 = vrot.slane %v1682_v63, 5  ;;  %v1467_v40 = vshll.u32 %v3356_v60, 16  ;;  %v1478_v33 = vshrl.u32 %v3365_v7, 16 }
 0x1d3   : > { %2117 = vrot.lane.b32.xlu1 %v2519_v34, %s2654_s30  ;;  %2071 = vrot.lane.b32.xlu0 %v2512_v38, %s2652_s27  ;;  %v3383_v55 = vrot.slane %v1693_v15, 4  ;;  %v1466_v20 = vrot.slane %v1464_v51, 4  ;;  %v1473_v22 = vshll.u32 %v3299_v10, 16  ;;  %v1481_v49 = vshll.u32 %v3365_v7, 16 }
 0x1d4   : > { %v1469_v3 = vrot.slane %v1467_v40, 5  ;;  %v1480_v46 = vrot.slane %v1478_v33, 4  ;;  %v1487_v31 = vshll.u32 %v3305_v8, 16  ;;  %v1657_v4 = vor.u32 %v3313_v58, %v3310_v26 }
 0x1d5   : > { %v3392_v2 = vrot.slane %v1696_v47, 5  ;;  %v1483_v54 = vrot.slane %v1481_v49, 5  ;;  %v1660_v19 = vshll.u32 %v3343_v29, 16  ;;  %v1671_v35 = vor.u32 %v1670_v59, %v1667_v27 }
 0x1d6   : > { %v1470_v10 = vor.u32 %v1469_v3, %v1466_v20  ;;  %v1658_v57 = vrot.slane %v1657_v4, 4  ;;  %v1674_v39 = vshll.u32 %v3349_v32, 16  ;;  %v2472_v61 = vrot.slane %v1525_v24, 9  ;;  %v3424_v3 = vld [vmem:[#allocation2 + $0x3c] sm:$0x1] }
 0x1d7   : > { %2033 = vrot.lane.b32.xlu1 %v2505_v9, %s2650_s25  ;;  %v1475_v8 = vrot.slane %v1473_v22, 5  ;;  %v1484_v26 = vor.u32 %v1483_v54, %v1480_v46  ;;  %v1672_v58 = vrot.slane %v1671_v35, 4  ;;  %v1572_v16 = vrot.slane %v3379_v44, 5  ;;  %v3411_v9 = vld [vmem:[#allocation2 + $0x34] sm:$0x1] }
 0x1d8   : > { %v1471_v12 = vrot.slane %v1470_v10, 4  ;;  %v1489_v17 = vrot.slane %v1487_v31, 5  ;;  %v1662_v13 = vrot.slane %v1660_v19, 5  ;;  %v1676_v29 = vrot.slane %v1674_v39, 5  ;;  %v3419_v22 = vld [vmem:[#allocation2 + $0x48] sm:$0xe] }
 0x1d9   : > { %v1485_v27 = vrot.slane %v1484_v26, 4  ;;  %v2473_v21 = vrot.slane %v1526_v42, 9  ;;  %v1576_v59 = vrot.slane %v3390_v36, 5  ;;  %v1492_v32 = vshrl.u32 %v3396_v18, 16  ;;  %v1592_v35 = vld [vmem:[#allocation2 + $0x3c] sm:$0x1] }
 0x1da   : > { %v1663_v1 = vsel %vm2749_vm2, %v1658_v57, %v1662_v13  ;;  %v1677_v63 = vsel %vm2749_vm2, %v1672_v58, %v1676_v29  ;;  %v1573_v6 = vsel %vm3096_vm9, %v2472_v61, %v1572_v16  ;;  %v1495_v23 = vshll.u32 %v3396_v18, 16  ;;  %v1712_v42 = vld [vmem:[#allocation2 + $0x38] sm:$0xe]  ;;  %v1713_v61 = vld [vmem:[#allocation2 + $0x40] sm:$0xe] }
 0x1db   : > { %v1476_v15 = vsel %vm2749_vm2, %v1471_v12, %v1475_v8  ;;  %v1490_v34 = vsel %vm2749_vm2, %v1485_v27, %v1489_v17  ;;  %v2508_v38 = vcombine.low %v1663_v1, %v1677_v63  ;;  %v1494_v47 = vrot.slane %v1492_v32, 4  ;;  %v1593_v58 = vld [vmem:[#allocation2 + $0x44] sm:$0x1] }
 0x1dc   : > { %v2496_v51 = vcombine.low %v1476_v15, %v1490_v34  ;;  %v1497_v40 = vrot.slane %v1495_v23, 5  ;;  %v1501_v33 = vshll.u32 %v3379_v44, 16  ;;  %v1506_v20 = vshrl.u32 %v3401_v0, 16  ;;  %v1769_v34 = vld [vmem:[#allocation2 + $0x40] sm:$0xf] }
 0x1dd   : > { %2051 = vrot.lane.b32.xlu1 %v2508_v38, %s2653_s28  ;;  %v1509_v49 = vshll.u32 %v3401_v0, 16  ;;  %v1515_v24 = vshll.u32 %v3390_v36, 16  ;;  %v1842_v46 = vor.u32 %v3307_v11, %v3303_v50  ;;  %v1845_v31 = vshll.u32 %v3411_v9, 16  ;;  %v1777_v38 = vld [vmem:[#allocation2 + $0x44] sm:$0x1] }
 0x1de   : > { %1983 = vrot.lane.b32.xlu0 %v2496_v51, %s2643_s29  ;;  %v1577_v44 = vsel %vm3096_vm9, %v2473_v21, %v1576_v59  ;;  %v1498_v4 = vor.u32 %v1497_v40, %v1494_v47  ;;  %v1508_v54 = vrot.slane %v1506_v20, 4  ;;  %v1856_v19 = vor.u32 %v3268_v48, %v3266_v14 }
 0x1df   : > { %v2501_v36 = vcombine.low %v1573_v6, %v1577_v44  ;;  %v1511_v10 = vrot.slane %v1509_v49, 5  ;;  %v1843_v57 = vrot.slane %v1842_v46, 4  ;;  %v1847_v39 = vrot.slane %v1845_v31, 5 }
 0x1e0   : > { %v1499_v50 = vrot.slane %v1498_v4, 4  ;;  %v1503_v11 = vrot.slane %v1501_v33, 5  ;;  %v1857_v8 = vrot.slane %v1856_v19, 4  ;;  %v1859_v26 = vshll.u32 %v3424_v3, 16 }
 0x1e1   : > { %v1512_v16 = vor.u32 %v1511_v10, %v1508_v54  ;;  %v1517_v12 = vrot.slane %v1515_v24, 5  ;;  %v1848_v17 = vsel %vm2749_vm2, %v1843_v57, %v1847_v39  ;;  %v2489_v14 = vrot.slane %v3419_v22, 9  ;;  %v1896_v39 = vld [vmem:[#allocation2 + $0x38] sm:$0xe] }
 0x1e2   : > { %2005 = vrot.lane.b32.xlu0 %v2501_v36, %s2648_s14  ;;  %v1504_v48 = vsel %vm2749_vm2, %v1499_v50, %v1503_v11  ;;  %v1861_v13 = vrot.slane %v1859_v26, 5  ;;  %v2480_v29 = vrot.slane %v1712_v42, 9  ;;  %v2481_v27 = vrot.slane %v1713_v61, 9  ;;  %v1895_v42 = vld [vmem:[#allocation2 + $0x30] sm:$0xe] }
 0x1e3   : > { %v1513_v21 = vrot.slane %v1512_v16, 4  ;;  %v1760_v59 = vrot.slane %v1593_v58, 5  ;;  %v1685_v32 = vor.u32 %v3375_v28, %v3373_v43  ;;  %v1688_v1 = vshll.u32 %v1592_v35, 16  ;;  %v1897_v61 = vld [vmem:[#allocation2 + $0x40] sm:$0xe] }
 0x1e4   : > { %v1862_v63 = vsel %vm2749_vm2, %v1857_v8, %v1861_v13  ;;  %v1756_v6 = vrot.slane %v1592_v35, 5  ;;  %v1699_v23 = vor.u32 %v3392_v2, %v3383_v55  ;;  %v1702_v15 = vshll.u32 %v1593_v58, 16  ;;  %v1894_v35 = vld [vmem:[#allocation2 + $0x28] sm:$0xe] }
 0x1e5   : > { %v1518_v47 = vsel %vm2749_vm2, %v1513_v21, %v1517_v12  ;;  %v2520_v51 = vcombine.low %v1848_v17, %v1862_v63  ;;  %v1686_v40 = vrot.slane %v1685_v32, 4  ;;  %v1890_v43 = vsel %vm2749_vm2, %v3116_v52, %v3118_v53  ;;  %v1893_v53 = vld [vmem:[#allocation2 + $0x20] sm:$0xe] }
 0x1e6   : > { %v2497_v28 = vcombine.low %v1504_v48, %v1518_v47  ;;  %v1761_v33 = vsel %vm3096_vm9, %v2481_v27, %v1760_v59  ;;  %v1690_v20 = vrot.slane %v1688_v1, 5  ;;  %v1700_v22 = vrot.slane %v1699_v23, 4 }
 0x1e7   : > { %2119 = vrot.lane.b32.xlu0 %v2520_v51, %s2654_s30  ;;  %v1704_v55 = vrot.slane %v1702_v15, 5  ;;  %v1864_v2 = vshrl.u32 %v1769_v34, 16  ;;  %v1867_v49 = vshll.u32 %v1769_v34, 16  ;;  %v1873_v24 = vshll.u32 %v1777_v38, 16 }
 0x1e8   : > { %v1925_v46 = vrot.slane %v3320_v45, 5  ;;  %v1929_v31 = vrot.slane %v3330_v41, 5  ;;  %1985 = vrot.lane.b32.xlu1 %v2497_v28, %s2643_s29  ;;  %v1757_v52 = vsel %vm3096_vm9, %v2480_v29, %v1756_v6  ;;  %v3580_v44 = vrot.slane %v3102_v37, 5 }
 0x1e9   : > { %v1691_v54 = vsel %vm2749_vm2, %v1686_v40, %v1690_v20  ;;  %v1705_v45 = vsel %vm2749_vm2, %v1700_v22, %v1704_v55  ;;  %v1866_v19 = vrot.slane %v1864_v2, 4  ;;  %v1869_v41 = vrot.slane %v1867_v49, 5  ;;  %v2632_v20 = vld [vmem:[#allocation2] sm:$0xf] }
 0x1ea   : > { %v3465_v4 = vsel %vm3096_vm9, %v2489_v14, %v3580_v44  ;;  %v1933_v36 = vrot.slane %v3411_v9, 5  ;;  %v1937_v10 = vrot.slane %v3424_v3, 5  ;;  %v2513_v57 = vcombine.low %v1757_v52, %v1761_v33 }
 0x1eb   : > { %v2509_v37 = vcombine.low %v1691_v54, %v1705_v45  ;;  %v1870_v50 = vor.u32 %v1869_v41, %v1866_v19  ;;  %v1875_v11 = vrot.slane %v1873_v24, 5  ;;  %v1941_v8 = vrot.slane %v1777_v38, 5 }
 0x1ec   : > { %v2491_v26 = vcombine.low %v3270_v25, %v3284_v5  ;;  %2073 = vrot.lane.b32.xlu1 %v2513_v57, %s2652_s27  ;;  %v2484_v58 = vrot.slane %v1893_v53, 9  ;;  %v2485_v16 = vrot.slane %v1894_v35, 9  ;;  %v2492_v9 = vcombine.low %v3356_v60, %v3365_v7  ;;  %v3484_v25 = vld [vmem:[%s3563_s3] sm:$0xff]  ;;  %v2631_v5 = vld [vmem:[#allocation2 + $0x48] sm:$0xf] }
 0x1ed   : > { %2053 = vrot.lane.b32.xlu0 %v2509_v37, %s2653_s28  ;;  %v2486_v3 = vrot.slane %v1895_v42, 9  ;;  %v1871_v12 = vrot.slane %v1870_v50, 4  ;;  %v2487_v17 = vrot.slane %v1896_v39, 9  ;;  %v2493_v14 = vcombine.low %v3396_v18, %v3401_v0 }
 0x1ee   : > { %v2488_v48 = vrot.slane %v1897_v61, 9  ;;  %v2517_v13 = vcombine.low %v1769_v34, %v2631_v5  ;;  %v1926_v29 = vsel %vm3096_vm9, %v2484_v58, %v1925_v46  ;;  %v1930_v27 = vsel %vm3096_vm9, %v2485_v16, %v1929_v31 }
 0x1ef   : > { %v1934_v21 = vsel %vm3096_vm9, %v2486_v3, %v1933_v36  ;;  %v1876_v59 = vsel %vm2749_vm2, %v1871_v12, %v1875_v11  ;;  %v2523_v32 = vcombine.low %v1926_v29, %v1930_v27  ;;  %v1938_v1 = vsel %vm3096_vm9, %v2487_v17, %v1937_v10 }
 0x1f0   : > { %v3498_v63 = vsel %vm3096_vm9, %v2488_v48, %v1941_v8  ;;  %v2521_v6 = vcombine.low %v1876_v59, %v1890_v43  ;;  %v2524_v23 = vcombine.low %v1934_v21, %v1938_v1  ;;  %v2527_v34 = vcombine.high %v3484_v25, %v3484_v25 }
 0x1f1   : > { %2101 = vrot.lane.b32.xlu0 %v2517_v13, %s2651_s26  ;;  %v2525_v15 = vcombine.low %v3498_v63, %v3465_v4  ;;  %v2490_v22 = vcombine.low %v2632_v20, %v3214_v62  ;;  %vm2155_vm2 = vcmask 392192   ;;  %vm2164_vm5 = vcmask 523264  }
 0x1f2   : > { %2121 = vrot.lane.b32.xlu1 %v2521_v6, %s2654_s30  ;;  %2532 = vmatprep.mubr.msk.bf16.mxu1 %vm938_vm7, %v2527_v34  ;;  %v2526_v4 = vcombine.low %v3484_v25, %v3484_v25 }
 0x1f5   : > { %2208 = vperm.xlu0 %2581, %v2205_v56  }
 0x20e   : > { %v2030_v30 = vpop.permute.xlu1 %2029 }
 0x20f   : > { %v2028_v38 = vpop.permute.xlu0 %2027 }
 0x212   : > { %v2096_v47 = vpop.permute.xlu1 %2095 }
 0x219   : > { %v2068_v51 = vpop.permute.xlu0 %2067 }
 0x21b   : > { %v2000_v40 = vpop.permute.xlu1 %1999 }
 0x21f   : > { %v2002_v43 = vpop.permute.xlu0 %2001 }
 0x228   : > { %v2070_v28 = vpop.permute.xlu1 %2069 }
 0x22d   : > { %v2098_v33 = vpop.permute.xlu0 %2097 }
 0x22f   : > { %v2100_v55 = vpop.permute.xlu1 %2099 }
 0x231   : > { %v1980_v2 = vpop.permute.xlu0 %1979 }
 0x232   : > { %v2137_v49 = vsel %vm938_vm7, %v2490_v22, %v1980_v2 }
 0x233   : > { %v2148_v24 = vsel %vm974_vm11, %v2137_v49, %v2000_v40  ;;  %v2048_v46 = vpop.permute.xlu1 %2047 }
 0x234   : > { %v2157_v52 = vsel %vm2155_vm2, %v2148_v24, %v2028_v38 }
 0x235   : > { %v2166_v53 = vsel %vm2164_vm5, %v2157_v52, %v2048_v46 }
 0x236   : > { %v2175_v45 = vsel %vm2173_vm10, %v2166_v53, %v2068_v51 }
 0x237   : > { %v2050_v31 = vpop.permute.xlu0 %2049  ;;  %v2184_v36 = vsel %vm2182_vm12, %v2175_v45, %v2096_v47 }
 0x23b   : > { %v2032_v44 = vpop.permute.xlu0 %2031 }
 0x23d   : > { %v1982_v54 = vpop.permute.xlu1 %1981 }
 0x23e   : > { %v2140_v62 = vsel %vm938_vm7, %v2491_v26, %v1982_v54 }
 0x23f   : > { %v2150_v19 = vsel %vm974_vm11, %v2140_v62, %v2002_v43 }
 0x240   : > { %v2159_v41 = vsel %vm2155_vm2, %v2150_v19, %v2030_v30 }
 0x241   : > { %v2004_v35 = vpop.permute.xlu1 %2003  ;;  %v2116_v42 = vpop.permute.xlu0 %2115  ;;  %v2168_v57 = vsel %vm2164_vm5, %v2159_v41, %v2050_v31 }
 0x242   : > { %v2193_v10 = vsel %vm2191_vm13, %v2184_v36, %v2116_v42  ;;  %v2177_v39 = vsel %vm2173_vm10, %v2168_v57, %v2070_v28 }
 0x243   : > { %2233 = vmatpush1.bf16.xpose.msra.mxu1 %v2193_v10  ;;  %v2186_v61 = vsel %vm2182_vm12, %v2177_v39, %v2098_v33 }
 0x244   : > { %2529 = vmatprep.subr.msk.bf16.mxu1 %vm938_vm7, %v2523_v32 }
 0x245   : > { %v2118_v37 = vpop.permute.xlu1 %2117  ;;  %v2072_v50 = vpop.permute.xlu0 %2071 }
 0x246   : > { %v2196_v11 = vsel %vm2191_vm13, %v2186_v61, %v2118_v37 }
 0x249   : > { %v2034_v8 = vpop.permute.xlu1 %2033 }
 0x24b   : > { %2235 = vmatpush1.bf16.xpose.msra.mxu1 %v2196_v11 }
 0x24c   : > { %2530 = vmatprep.subr.msk.bf16.mxu1 %vm938_vm7, %v2524_v23 }
 0x24f   : > { %v2052_v16 = vpop.permute.xlu1 %2051 }
 0x250   : > { %v1984_v26 = vpop.permute.xlu0 %1983 }
 0x251   : > { %v2143_v58 = vsel %vm938_vm7, %v2492_v9, %v1984_v26 }
 0x252   : > { %v2152_v3 = vsel %vm974_vm11, %v2143_v58, %v2004_v35 }
 0x253   : > { %v2161_v12 = vsel %vm2155_vm2, %v2152_v3, %v2032_v44 }
 0x254   : > { %v2170_v17 = vsel %vm2164_vm5, %v2161_v12, %v2052_v16  ;;  %v2006_v48 = vpop.permute.xlu0 %2005 }
 0x255   : > { %v2179_v5 = vsel %vm2173_vm10, %v2170_v17, %v2072_v50 }
 0x256   : > { %v2188_v29 = vsel %vm2182_vm12, %v2179_v5, %v2100_v55 }
 0x259   : > { %v2120_v13 = vpop.permute.xlu0 %2119 }
 0x25a   : > { %v1986_v27 = vpop.permute.xlu1 %1985  ;;  %v2199_v21 = vsel %vm2191_vm13, %v2188_v29, %v2120_v13 }
 0x25b   : > { %v2146_v60 = vsel %vm938_vm7, %v2493_v14, %v1986_v27  ;;  %2237 = vmatpush1.bf16.xpose.msra.mxu1 %v2199_v21 }
 0x25c   : > { %v2154_v7 = vsel %vm974_vm11, %v2146_v60, %v2006_v48  ;;  %2531 = vmatprep.subr.msk.bf16.mxu1 %vm938_vm7, %v2525_v15  ;;  %vm2274_vm7 = vcmask 519168  }
 0x25d   : > { %v2163_v32 = vsel %vm2155_vm2, %v2154_v7, %v2034_v8 }
 0x25e   : > { %v2074_v9 = vpop.permute.xlu1 %2073 }
 0x25f   : > { %v2054_v59 = vpop.permute.xlu0 %2053 }
 0x260   : > { %v2172_v1 = vsel %vm2164_vm5, %v2163_v32, %v2054_v59 }
 0x261   : > { %v2181_v18 = vsel %vm2173_vm10, %v2172_v1, %v2074_v9 }
 0x263   : > { %v2102_v6 = vpop.permute.xlu0 %2101 }
 0x264   : > { %v2190_v0 = vsel %vm2182_vm12, %v2181_v18, %v2102_v6  ;;  %v2122_v14 = vpop.permute.xlu1 %2121 }
 0x265   : > { %v2202_v23 = vsel %vm2191_vm13, %v2190_v0, %v2122_v14 }
 0x266   : > { %2239 = vmatpush1.bf16.xpose.msra.mxu1 %v2202_v23 }
 0x26d   : > { %2265 = vmatmul.mubr.bf16.vlgmr.msra.gmra.mrb[0].mxu1 %v2526_v4 }
 0x274   : > { %v2209_v63 = vpop.permute.xlu0 %2208 }
 0x340   : > { %v2266_v15 = vpop.f32.mrb[0].mxu1 }
 0x341   : > { %v2267_v34 = vadd.f32 %v2266_v15, %v2209_v63  ;;  %v2268_v56 = vpop.f32.mrb[1].mxu1 }
 0x342   : > { %v2269_v30 = vpop.f32.mrb[2].mxu1 }
 0x343   : > { %v2272_v38 = vmax.f32 %v2267_v34, 0.0  ;;  %v2270_v47 = vpop.f32.mrb[3].mxu1 }
 0x345   : > { %v2273_v51 = vpack.c.bf16 %v2272_v38, %v2272_v38 }
 0x347   : > { %2275 = vst.msk [vmem:[%s269_s13] sm:$0xf] %vm2274_vm7, %v2273_v51 }
 0x348 PF: > { %s16_s21 = sadd.s32 1, %s2639_s21  }
 0x349   : > { %p13_p4 = scmp.ge.s32.totalorder %s16_s21, 4  }
 0x34b   :  { %15 = sbr.rel (!%p13_p4) target bundleno = 1 (0x1), region = 85 }

</bundles_post_ra>
